<compile_context>
chip_gen: v7x
topology: tpu7x:2x2x1
jax: 0.10.0
libtpu: 0.0.40
codegen_flags: <defaults>
</compile_context>

<pallas_src>
import math
import functools

import jax
import jax.numpy as jnp
from jax.experimental import pallas as pl
from jax.experimental.pallas import tpu as pltpu


# ---------------------------------------------------------------------------
# Fused kernel: embed + nlayers encoder layers + decode, one batch element
# per grid step.
# ---------------------------------------------------------------------------

def _fused_forward_kernel(nhead,
                          src_ref, pe_ref, mask_ref,
                          wenc_ref, benc_ref,
                          wqkv_ref, bqkv_ref, wo_ref, bo_ref,
                          ln1g_ref, ln1b_ref,
                          w1_ref, b1_ref, w2_ref, b2_ref,
                          ln2g_ref, ln2b_ref,
                          wdec_ref, bdec_ref,
                          o_ref):
    src = src_ref[0]              # (S, 1)
    pe = pe_ref[...]              # (S, D)
    mask = mask_ref[0]            # (S, S) additive: causal + key padding
    S, D = pe.shape
    dh = D // nhead
    nlayers = wqkv_ref.shape[0]

    # encoder Linear(1, D) + positional encoding (dropout = identity)
    x = src * wenc_ref[...] + benc_ref[...] + pe      # (S, D)

    def layernorm(v, g, b):
        mu = jnp.mean(v, axis=-1, keepdims=True)
        var = jnp.mean((v - mu) ** 2, axis=-1, keepdims=True)
        return (v - mu) * jax.lax.rsqrt(var + 1e-5) * g + b

    for l in range(nlayers):
        # fused QKV projection; softmax scale is pre-folded into the Q block
        qkv = jnp.dot(x, wqkv_ref[l], preferred_element_type=jnp.float32) + bqkv_ref[l]
        q = qkv[:, 0 * D:1 * D]
        k = qkv[:, 1 * D:2 * D]
        v = qkv[:, 2 * D:3 * D]

        heads = []
        for h in range(nhead):
            sl = slice(h * dh, (h + 1) * dh)
            # q @ k^T without an explicit transpose: contract on the last dim
            s = jax.lax.dot_general(
                q[:, sl], k[:, sl],
                dimension_numbers=(((1,), (1,)), ((), ())),
                preferred_element_type=jnp.float32) + mask        # (S, S)
            m = jnp.max(s, axis=-1, keepdims=True)
            e = jnp.exp(s - m)
            p = e * pl.reciprocal(jnp.sum(e, axis=-1, keepdims=True), approx=True)
            heads.append(jnp.dot(p, v[:, sl], preferred_element_type=jnp.float32))
        attn = heads[0] if nhead == 1 else jnp.concatenate(heads, axis=-1)   # (S, D)
        attn = jnp.dot(attn, wo_ref[l], preferred_element_type=jnp.float32) + bo_ref[l]

        # residual + LayerNorm 1 (post-norm)
        y = layernorm(x + attn, ln1g_ref[l], ln1b_ref[l])

        # feed-forward (ReLU) + residual + LayerNorm 2
        h1 = jnp.maximum(
            jnp.dot(y, w1_ref[l], preferred_element_type=jnp.float32) + b1_ref[l], 0.0)
        h2 = jnp.dot(h1, w2_ref[l], preferred_element_type=jnp.float32) + b2_ref[l]
        x = layernorm(y + h2, ln2g_ref[l], ln2b_ref[l])

    # decoder Linear(D, 1): lane reduce on one (S, D) tile (D=32, negligible)
    out = jnp.sum(x * wdec_ref[...], axis=-1, keepdims=True) + bdec_ref[...]  # (S, 1)
    o_ref[0] = out


# ---------------------------------------------------------------------------
# Parameters (deterministic, synthetic; mirrors init_weights of the module)
# ---------------------------------------------------------------------------

def init_params(key, ninp, nhid, nlayers):
    keys = jax.random.split(key, 2 + nlayers)
    initrange = 0.1
    p = {
        # Linear(1, ninp): weight (ninp, 1) stored as row (1, ninp)
        'w_enc': jax.random.uniform(keys[0], (1, ninp), jnp.float32, -initrange, initrange),
        'b_enc': jnp.zeros((1, ninp), jnp.float32),
        # Linear(ninp, 1): weight (1, ninp)
        'w_dec': jax.random.uniform(keys[1], (1, ninp), jnp.float32, -initrange, initrange),
        'b_dec': jnp.zeros((1, 1), jnp.float32),
        'layers': [],
    }
    ba = 1.0 / math.sqrt(ninp)
    bh = 1.0 / math.sqrt(nhid)
    for l in range(nlayers):
        lk = jax.random.split(keys[2 + l], 8)
        # weights stored already transposed for right-multiply: x @ W.T -> x @ w
        layer = dict(
            wq=jax.random.uniform(lk[0], (ninp, ninp), jnp.float32, -ba, ba),
            wk=jax.random.uniform(lk[1], (ninp, ninp), jnp.float32, -ba, ba),
            wv=jax.random.uniform(lk[2], (ninp, ninp), jnp.float32, -ba, ba),
            bq=jnp.zeros((1, ninp), jnp.float32),
            bk=jnp.zeros((1, ninp), jnp.float32),
            bv=jnp.zeros((1, ninp), jnp.float32),
            wo=jax.random.uniform(lk[3], (ninp, ninp), jnp.float32, -ba, ba),
            bo=jnp.zeros((1, ninp), jnp.float32),
            ln1g=jnp.ones((1, ninp), jnp.float32),
            ln1b=jnp.zeros((1, ninp), jnp.float32),
            w1=jax.random.uniform(lk[4], (ninp, nhid), jnp.float32, -ba, ba),
            b1=jax.random.uniform(lk[5], (1, nhid), jnp.float32, -ba, ba),
            w2=jax.random.uniform(lk[6], (nhid, ninp), jnp.float32, -bh, bh),
            b2=jax.random.uniform(lk[7], (1, ninp), jnp.float32, -bh, bh),
            ln2g=jnp.ones((1, ninp), jnp.float32),
            ln2b=jnp.zeros((1, ninp), jnp.float32),
        )
        p['layers'].append(layer)
    return p


# ---------------------------------------------------------------------------
# Forward (wrapper glue + single fused pallas_call)
# ---------------------------------------------------------------------------

@functools.partial(jax.jit, static_argnames=("nhead",))
def transformer_forward(params, src, lengths, *, nhead):
    """src: (S, B, 1) float32, lengths: (B,) int32 -> (S, B, 1) float32."""
    S, B, _ = src.shape
    D = params['w_enc'].shape[1]
    L = len(params['layers'])
    nhid = params['layers'][0]['w1'].shape[1]
    dh = D // nhead
    scale = 1.0 / math.sqrt(dh)

    # --- glue: positional encoding table (same formula as PositionalEncoding) ---
    position = jnp.arange(S, dtype=jnp.float32)[:, None]
    div_term = jnp.exp(jnp.arange(0, D, 2, dtype=jnp.float32) * (-math.log(10000.0) / D))
    pe = jnp.zeros((S, D), jnp.float32)
    pe = pe.at[:, 0::2].set(jnp.sin(position * div_term))
    pe = pe.at[:, 1::2].set(jnp.cos(position * div_term))

    # --- glue: combined additive mask (causal + key padding), built once ---
    neg_inf = jnp.float32(-jnp.inf)
    causal = jnp.where(jnp.tril(jnp.ones((S, S), bool)), 0.0, neg_inf).astype(jnp.float32)
    pad_bool = jnp.arange(S)[None, :] >= lengths[:, None]          # True = masked
    kpm = jnp.where(pad_bool, neg_inf, 0.0).astype(jnp.float32)    # (B, S)
    mask = causal[None, :, :] + kpm[:, None, :]                    # (B, S, S)

    # --- glue: stack per-layer weights; fuse QKV; fold softmax scale into Q ---
    def stack(name):
        return jnp.stack([lyr[name] for lyr in params['layers']])

    w_qkv = jnp.stack([
        jnp.concatenate([lyr['wq'] * scale, lyr['wk'], lyr['wv']], axis=1)
        for lyr in params['layers']])                              # (L, D, 3D)
    b_qkv = jnp.stack([
        jnp.concatenate([lyr['bq'] * scale, lyr['bk'], lyr['bv']], axis=1)
        for lyr in params['layers']])                              # (L, 1, 3D)
    w_o, b_o = stack('wo'), stack('bo')
    ln1g, ln1b = stack('ln1g'), stack('ln1b')
    w1, b1 = stack('w1'), stack('b1')
    w2, b2 = stack('w2'), stack('b2')
    ln2g, ln2b = stack('ln2g'), stack('ln2b')

    src_b = jnp.transpose(src, (1, 0, 2))                          # (B, S, 1) batch-major

    # --- BlockSpecs: per-batch blocks for activations/masks, full blocks for weights ---
    def full(shape):
        return pl.BlockSpec(tuple(shape), lambda b, n=len(shape): (0,) * n)

    def per_batch(shape):
        rest = tuple(shape[1:])
        return pl.BlockSpec((1,) + rest, lambda b, n=len(rest): (b,) + (0,) * n)

    operands = (src_b, pe, mask,
                params['w_enc'], params['b_enc'],
                w_qkv, b_qkv, w_o, b_o,
                ln1g, ln1b, w1, b1, w2, b2, ln2g, ln2b,
                params['w_dec'], params['b_dec'])

    in_specs = [
        per_batch((B, S, 1)),          # src
        full((S, D)),                  # positional encoding
        per_batch((B, S, S)),          # combined additive mask
        full((1, D)), full((1, D)),    # w_enc, b_enc
        full((L, D, 3 * D)), full((L, 1, 3 * D)),   # fused QKV
        full((L, D, D)), full((L, 1, D)),           # attention output proj
        full((L, 1, D)), full((L, 1, D)),           # ln1 gamma, beta
        full((L, D, nhid)), full((L, 1, nhid)),     # ffn w1, b1
        full((L, nhid, D)), full((L, 1, D)),        # ffn w2, b2
        full((L, 1, D)), full((L, 1, D)),           # ln2 gamma, beta
        full((1, D)), full((1, 1)),                 # w_dec, b_dec
    ]

    # advisory cost estimate so XLA can overlap the tiny kernel with wrapper ops
    flops_per_b = (2 * S * D                                    # embed
                   + L * (2 * S * D * 3 * D                     # QKV
                          + 4 * S * S * D                       # scores + PV
                          + 2 * S * D * D                       # output proj
                          + 4 * S * D * nhid)                   # FFN
                   + 2 * S * D)                                 # decode
    bytes_accessed = sum(int(a.size) * 4 for a in operands) + B * S * 4
    cost = pl.CostEstimate(flops=int(B * flops_per_b),
                           transcendentals=int(B * L * nhead * S * S),
                           bytes_accessed=int(bytes_accessed))

    out_b = pl.pallas_call(
        functools.partial(_fused_forward_kernel, nhead),
        out_shape=jax.ShapeDtypeStruct((B, S, 1), jnp.float32),
        grid=(B,),
        in_specs=in_specs,
        out_specs=per_batch((B, S, 1)),
        compiler_params=pltpu.CompilerParams(dimension_semantics=("parallel",)),
        cost_estimate=cost,
    )(*operands)

    # back to PyTorch layout (S, B, 1)
    return jnp.transpose(out_b, (1, 0, 2))


# ---------------------------------------------------------------------------

if __name__ == "__main__":
    S, B = 8, 2
    ninp, nhead, nhid, nlayers = 32, 2, 64, 2

    key = jax.random.PRNGKey(0)
    k_param, k_src = jax.random.split(key)

    params = init_params(k_param, ninp, nhid, nlayers)
    src = jax.random.normal(k_src, (S, B, 1), dtype=jnp.float32)
    lengths = jnp.array([8, 5], dtype=jnp.int32)   # max(lengths) == S, all >= 1

    out = transformer_forward(params, src, lengths, nhead=nhead)
    out = jax.block_until_ready(out)

    assert out.shape == (S, B, 1), out.shape
    assert bool(jnp.all(jnp.isfinite(out)))
    print("KERNEL_OK")
</pallas_src>

<mosaic_0001>
module attributes {stable_mosaic.version = 11 : i64} {
  func.func @_fused_forward_kernel(%arg0: i32, %arg1: memref<1x8x1xf32, #tpu.memory_space<vmem>>, %arg2: memref<8x32xf32, #tpu.memory_space<vmem>>, %arg3: memref<1x8x8xf32, #tpu.memory_space<vmem>>, %arg4: memref<1x32xf32, #tpu.memory_space<vmem>>, %arg5: memref<1x32xf32, #tpu.memory_space<vmem>>, %arg6: memref<2x32x96xf32, #tpu.memory_space<vmem>>, %arg7: memref<2x1x96xf32, #tpu.memory_space<vmem>>, %arg8: memref<2x32x32xf32, #tpu.memory_space<vmem>>, %arg9: memref<2x1x32xf32, #tpu.memory_space<vmem>>, %arg10: memref<2x1x32xf32, #tpu.memory_space<vmem>>, %arg11: memref<2x1x32xf32, #tpu.memory_space<vmem>>, %arg12: memref<2x32x64xf32, #tpu.memory_space<vmem>>, %arg13: memref<2x1x64xf32, #tpu.memory_space<vmem>>, %arg14: memref<2x64x32xf32, #tpu.memory_space<vmem>>, %arg15: memref<2x1x32xf32, #tpu.memory_space<vmem>>, %arg16: memref<2x1x32xf32, #tpu.memory_space<vmem>>, %arg17: memref<2x1x32xf32, #tpu.memory_space<vmem>>, %arg18: memref<1x32xf32, #tpu.memory_space<vmem>>, %arg19: memref<1x1xf32, #tpu.memory_space<vmem>>, %arg20: memref<1x8x1xf32, #tpu.memory_space<vmem>>) attributes {dimension_semantics = [#tpu.dimension_semantics<parallel>], iteration_bounds = array<i64: 2>, scalar_prefetch = 0 : i64, scratch_operands = 0 : i64, tpu.core_type = #tpu.core_type<tc>, window_params = [{transform_indices = @transform_0, window_bounds = array<i64: 1, 8, 1>}, {pipeline_mode = #tpu.pipeline_mode<synchronous>, transform_indices = @transform_1, window_bounds = array<i64: 8, 32>}, {transform_indices = @transform_2, window_bounds = array<i64: 1, 8, 8>}, {pipeline_mode = #tpu.pipeline_mode<synchronous>, transform_indices = @transform_3, window_bounds = array<i64: 1, 32>}, {pipeline_mode = #tpu.pipeline_mode<synchronous>, transform_indices = @transform_4, window_bounds = array<i64: 1, 32>}, {pipeline_mode = #tpu.pipeline_mode<synchronous>, transform_indices = @transform_5, window_bounds = array<i64: 2, 32, 96>}, {pipeline_mode = #tpu.pipeline_mode<synchronous>, transform_indices = @transform_6, window_bounds = array<i64: 2, 1, 96>}, {pipeline_mode = #tpu.pipeline_mode<synchronous>, transform_indices = @transform_7, window_bounds = array<i64: 2, 32, 32>}, {pipeline_mode = #tpu.pipeline_mode<synchronous>, transform_indices = @transform_8, window_bounds = array<i64: 2, 1, 32>}, {pipeline_mode = #tpu.pipeline_mode<synchronous>, transform_indices = @transform_9, window_bounds = array<i64: 2, 1, 32>}, {pipeline_mode = #tpu.pipeline_mode<synchronous>, transform_indices = @transform_10, window_bounds = array<i64: 2, 1, 32>}, {pipeline_mode = #tpu.pipeline_mode<synchronous>, transform_indices = @transform_11, window_bounds = array<i64: 2, 32, 64>}, {pipeline_mode = #tpu.pipeline_mode<synchronous>, transform_indices = @transform_12, window_bounds = array<i64: 2, 1, 64>}, {pipeline_mode = #tpu.pipeline_mode<synchronous>, transform_indices = @transform_13, window_bounds = array<i64: 2, 64, 32>}, {pipeline_mode = #tpu.pipeline_mode<synchronous>, transform_indices = @transform_14, window_bounds = array<i64: 2, 1, 32>}, {pipeline_mode = #tpu.pipeline_mode<synchronous>, transform_indices = @transform_15, window_bounds = array<i64: 2, 1, 32>}, {pipeline_mode = #tpu.pipeline_mode<synchronous>, transform_indices = @transform_16, window_bounds = array<i64: 2, 1, 32>}, {pipeline_mode = #tpu.pipeline_mode<synchronous>, transform_indices = @transform_17, window_bounds = array<i64: 1, 32>}, {pipeline_mode = #tpu.pipeline_mode<synchronous>, transform_indices = @transform_18, window_bounds = array<i64: 1, 1>}, {transform_indices = @transform_19, window_bounds = array<i64: 1, 8, 1>}]} {
    %c0 = arith.constant 0 : index
    %c0_0 = arith.constant 0 : index
    %c0_1 = arith.constant 0 : index
    %0 = vector.load %arg1[%c0, %c0_0, %c0_1] : memref<1x8x1xf32, #tpu.memory_space<vmem>>, vector<1x8x1xf32>
    %1 = vector.shape_cast %0 : vector<1x8x1xf32> to vector<8x1xf32>
    %c0_2 = arith.constant 0 : index
    %c0_3 = arith.constant 0 : index
    %2 = vector.load %arg2[%c0_2, %c0_3] : memref<8x32xf32, #tpu.memory_space<vmem>>, vector<8x32xf32>
    %c0_4 = arith.constant 0 : index
    %c0_5 = arith.constant 0 : index
    %c0_6 = arith.constant 0 : index
    %3 = vector.load %arg3[%c0_4, %c0_5, %c0_6] : memref<1x8x8xf32, #tpu.memory_space<vmem>>, vector<1x8x8xf32>
    %4 = vector.shape_cast %3 : vector<1x8x8xf32> to vector<8x8xf32>
    %c0_7 = arith.constant 0 : index
    %c0_8 = arith.constant 0 : index
    %5 = vector.load %arg4[%c0_7, %c0_8] : memref<1x32xf32, #tpu.memory_space<vmem>>, vector<1x32xf32>
    %6 = vector.broadcast %1 : vector<8x1xf32> to vector<8x32xf32>
    %7 = vector.broadcast %5 : vector<1x32xf32> to vector<8x32xf32>
    %8 = arith.mulf %6, %7 : vector<8x32xf32>
    %c0_9 = arith.constant 0 : index
    %c0_10 = arith.constant 0 : index
    %9 = vector.load %arg5[%c0_9, %c0_10] : memref<1x32xf32, #tpu.memory_space<vmem>>, vector<1x32xf32>
    %10 = vector.broadcast %9 : vector<1x32xf32> to vector<8x32xf32>
    %11 = arith.addf %8, %10 : vector<8x32xf32>
    %12 = arith.addf %11, %2 : vector<8x32xf32>
    %c0_11 = arith.constant 0 : index
    %c0_12 = arith.constant 0 : index
    %c0_13 = arith.constant 0 : index
    %13 = vector.load %arg6[%c0_11, %c0_12, %c0_13] : memref<2x32x96xf32, #tpu.memory_space<vmem>>, vector<1x32x96xf32>
    %14 = vector.shape_cast %13 : vector<1x32x96xf32> to vector<32x96xf32>
    %cst = arith.constant dense<0.000000e+00> : vector<8x96xf32>
    %15 = tpu.matmul %12, %14, %cst {dimension_numbers = #tpu.dot_dimension_numbers<[1], [0], [0], [1], [0, 0, 1, 1], [], []>} : vector<8x32xf32>, vector<32x96xf32>, vector<8x96xf32> -> vector<8x96xf32>
    %c0_14 = arith.constant 0 : index
    %c0_15 = arith.constant 0 : index
    %c0_16 = arith.constant 0 : index
    %16 = vector.load %arg7[%c0_14, %c0_15, %c0_16] : memref<2x1x96xf32, #tpu.memory_space<vmem>>, vector<1x1x96xf32>
    %17 = vector.shape_cast %16 : vector<1x1x96xf32> to vector<1x96xf32>
    %18 = vector.broadcast %17 : vector<1x96xf32> to vector<8x96xf32>
    %19 = arith.addf %15, %18 : vector<8x96xf32>
    %20 = vector.extract_strided_slice %19 {offsets = [0, 0], sizes = [8, 32], strides = [1, 1]} : vector<8x96xf32> to vector<8x32xf32>
    %21 = vector.extract_strided_slice %19 {offsets = [0, 32], sizes = [8, 32], strides = [1, 1]} : vector<8x96xf32> to vector<8x32xf32>
    %22 = vector.extract_strided_slice %19 {offsets = [0, 64], sizes = [8, 32], strides = [1, 1]} : vector<8x96xf32> to vector<8x32xf32>
    %23 = vector.extract_strided_slice %20 {offsets = [0, 0], sizes = [8, 16], strides = [1, 1]} : vector<8x32xf32> to vector<8x16xf32>
    %24 = vector.extract_strided_slice %21 {offsets = [0, 0], sizes = [8, 16], strides = [1, 1]} : vector<8x32xf32> to vector<8x16xf32>
    %cst_17 = arith.constant dense<0.000000e+00> : vector<8x8xf32>
    %25 = tpu.matmul %23, %24, %cst_17 {dimension_numbers = #tpu.dot_dimension_numbers<[1], [1], [0], [0], [0, 0, 1, 0], [], []>} : vector<8x16xf32>, vector<8x16xf32>, vector<8x8xf32> -> vector<8x8xf32>
    %26 = arith.addf %25, %4 : vector<8x8xf32>
    %cst_18 = arith.constant dense<0xFF800000> : vector<8xf32>
    %27 = vector.multi_reduction <maximumf>, %26, %cst_18 [1] : vector<8x8xf32> to vector<8xf32>
    %28 = vector.shape_cast %27 : vector<8xf32> to vector<8x1xf32>
    %29 = vector.broadcast %28 : vector<8x1xf32> to vector<8x8xf32>
    %30 = arith.subf %26, %29 : vector<8x8xf32>
    %31 = math.exp %30 : vector<8x8xf32>
    %cst_19 = arith.constant dense<0.000000e+00> : vector<8xf32>
    %32 = vector.multi_reduction <add>, %31, %cst_19 [1] : vector<8x8xf32> to vector<8xf32>
    %33 = vector.shape_cast %32 : vector<8xf32> to vector<8x1xf32>
    %34 = tpu.reciprocal %33 {approx = true} : vector<8x1xf32> -> vector<8x1xf32>
    %35 = vector.broadcast %34 : vector<8x1xf32> to vector<8x8xf32>
    %36 = arith.mulf %31, %35 : vector<8x8xf32>
    %37 = vector.extract_strided_slice %22 {offsets = [0, 0], sizes = [8, 16], strides = [1, 1]} : vector<8x32xf32> to vector<8x16xf32>
    %cst_20 = arith.constant dense<0.000000e+00> : vector<8x16xf32>
    %38 = tpu.matmul %36, %37, %cst_20 {dimension_numbers = #tpu.dot_dimension_numbers<[1], [0], [0], [1], [0, 0, 1, 1], [], []>} : vector<8x8xf32>, vector<8x16xf32>, vector<8x16xf32> -> vector<8x16xf32>
    %39 = vector.extract_strided_slice %20 {offsets = [0, 16], sizes = [8, 16], strides = [1, 1]} : vector<8x32xf32> to vector<8x16xf32>
    %40 = vector.extract_strided_slice %21 {offsets = [0, 16], sizes = [8, 16], strides = [1, 1]} : vector<8x32xf32> to vector<8x16xf32>
    %cst_21 = arith.constant dense<0.000000e+00> : vector<8x8xf32>
    %41 = tpu.matmul %39, %40, %cst_21 {dimension_numbers = #tpu.dot_dimension_numbers<[1], [1], [0], [0], [0, 0, 1, 0], [], []>} : vector<8x16xf32>, vector<8x16xf32>, vector<8x8xf32> -> vector<8x8xf32>
    %42 = arith.addf %41, %4 : vector<8x8xf32>
    %cst_22 = arith.constant dense<0xFF800000> : vector<8xf32>
    %43 = vector.multi_reduction <maximumf>, %42, %cst_22 [1] : vector<8x8xf32> to vector<8xf32>
    %44 = vector.shape_cast %43 : vector<8xf32> to vector<8x1xf32>
    %45 = vector.broadcast %44 : vector<8x1xf32> to vector<8x8xf32>
    %46 = arith.subf %42, %45 : vector<8x8xf32>
    %47 = math.exp %46 : vector<8x8xf32>
    %cst_23 = arith.constant dense<0.000000e+00> : vector<8xf32>
    %48 = vector.multi_reduction <add>, %47, %cst_23 [1] : vector<8x8xf32> to vector<8xf32>
    %49 = vector.shape_cast %48 : vector<8xf32> to vector<8x1xf32>
    %50 = tpu.reciprocal %49 {approx = true} : vector<8x1xf32> -> vector<8x1xf32>
    %51 = vector.broadcast %50 : vector<8x1xf32> to vector<8x8xf32>
    %52 = arith.mulf %47, %51 : vector<8x8xf32>
    %53 = vector.extract_strided_slice %22 {offsets = [0, 16], sizes = [8, 16], strides = [1, 1]} : vector<8x32xf32> to vector<8x16xf32>
    %cst_24 = arith.constant dense<0.000000e+00> : vector<8x16xf32>
    %54 = tpu.matmul %52, %53, %cst_24 {dimension_numbers = #tpu.dot_dimension_numbers<[1], [0], [0], [1], [0, 0, 1, 1], [], []>} : vector<8x8xf32>, vector<8x16xf32>, vector<8x16xf32> -> vector<8x16xf32>
    %55 = tpu.concatenate %38, %54 in 1 : vector<8x16xf32>, vector<8x16xf32> -> vector<8x32xf32>
    %c0_25 = arith.constant 0 : index
    %c0_26 = arith.constant 0 : index
    %c0_27 = arith.constant 0 : index
    %56 = vector.load %arg8[%c0_25, %c0_26, %c0_27] : memref<2x32x32xf32, #tpu.memory_space<vmem>>, vector<1x32x32xf32>
    %57 = vector.shape_cast %56 : vector<1x32x32xf32> to vector<32x32xf32>
    %cst_28 = arith.constant dense<0.000000e+00> : vector<8x32xf32>
    %58 = tpu.matmul %55, %57, %cst_28 {dimension_numbers = #tpu.dot_dimension_numbers<[1], [0], [0], [1], [0, 0, 1, 1], [], []>} : vector<8x32xf32>, vector<32x32xf32>, vector<8x32xf32> -> vector<8x32xf32>
    %c0_29 = arith.constant 0 : index
    %c0_30 = arith.constant 0 : index
    %c0_31 = arith.constant 0 : index
    %59 = vector.load %arg9[%c0_29, %c0_30, %c0_31] : memref<2x1x32xf32, #tpu.memory_space<vmem>>, vector<1x1x32xf32>
    %60 = vector.shape_cast %59 : vector<1x1x32xf32> to vector<1x32xf32>
    %61 = vector.broadcast %60 : vector<1x32xf32> to vector<8x32xf32>
    %62 = arith.addf %58, %61 : vector<8x32xf32>
    %63 = arith.addf %12, %62 : vector<8x32xf32>
    %c0_32 = arith.constant 0 : index
    %c0_33 = arith.constant 0 : index
    %c0_34 = arith.constant 0 : index
    %64 = vector.load %arg10[%c0_32, %c0_33, %c0_34] : memref<2x1x32xf32, #tpu.memory_space<vmem>>, vector<1x1x32xf32>
    %65 = vector.shape_cast %64 : vector<1x1x32xf32> to vector<1x32xf32>
    %c0_35 = arith.constant 0 : index
    %c0_36 = arith.constant 0 : index
    %c0_37 = arith.constant 0 : index
    %66 = vector.load %arg11[%c0_35, %c0_36, %c0_37] : memref<2x1x32xf32, #tpu.memory_space<vmem>>, vector<1x1x32xf32>
    %67 = vector.shape_cast %66 : vector<1x1x32xf32> to vector<1x32xf32>
    %cst_38 = arith.constant dense<0.000000e+00> : vector<8xf32>
    %68 = vector.multi_reduction <add>, %63, %cst_38 [1] : vector<8x32xf32> to vector<8xf32>
    %69 = vector.shape_cast %68 : vector<8xf32> to vector<8x1xf32>
    %cst_39 = arith.constant 3.200000e+01 : f32
    %70 = vector.broadcast %cst_39 : f32 to vector<8x1xf32>
    %71 = arith.divf %69, %70 : vector<8x1xf32>
    %72 = vector.broadcast %71 : vector<8x1xf32> to vector<8x32xf32>
    %73 = arith.subf %63, %72 : vector<8x32xf32>
    %74 = arith.mulf %73, %73 : vector<8x32xf32>
    %cst_40 = arith.constant dense<0.000000e+00> : vector<8xf32>
    %75 = vector.multi_reduction <add>, %74, %cst_40 [1] : vector<8x32xf32> to vector<8xf32>
    %76 = vector.shape_cast %75 : vector<8xf32> to vector<8x1xf32>
    %cst_41 = arith.constant 3.200000e+01 : f32
    %77 = vector.broadcast %cst_41 : f32 to vector<8x1xf32>
    %78 = arith.divf %76, %77 : vector<8x1xf32>
    %79 = vector.broadcast %71 : vector<8x1xf32> to vector<8x32xf32>
    %80 = arith.subf %63, %79 : vector<8x32xf32>
    %cst_42 = arith.constant 9.99999974E-6 : f32
    %81 = vector.broadcast %cst_42 : f32 to vector<8x1xf32>
    %82 = arith.addf %78, %81 : vector<8x1xf32>
    %83 = math.rsqrt %82 : vector<8x1xf32>
    %84 = vector.broadcast %83 : vector<8x1xf32> to vector<8x32xf32>
    %85 = arith.mulf %80, %84 : vector<8x32xf32>
    %86 = vector.broadcast %65 : vector<1x32xf32> to vector<8x32xf32>
    %87 = arith.mulf %85, %86 : vector<8x32xf32>
    %88 = vector.broadcast %67 : vector<1x32xf32> to vector<8x32xf32>
    %89 = arith.addf %87, %88 : vector<8x32xf32>
    %c0_43 = arith.constant 0 : index
    %c0_44 = arith.constant 0 : index
    %c0_45 = arith.constant 0 : index
    %90 = vector.load %arg12[%c0_43, %c0_44, %c0_45] : memref<2x32x64xf32, #tpu.memory_space<vmem>>, vector<1x32x64xf32>
    %91 = vector.shape_cast %90 : vector<1x32x64xf32> to vector<32x64xf32>
    %cst_46 = arith.constant dense<0.000000e+00> : vector<8x64xf32>
    %92 = tpu.matmul %89, %91, %cst_46 {dimension_numbers = #tpu.dot_dimension_numbers<[1], [0], [0], [1], [0, 0, 1, 1], [], []>} : vector<8x32xf32>, vector<32x64xf32>, vector<8x64xf32> -> vector<8x64xf32>
    %c0_47 = arith.constant 0 : index
    %c0_48 = arith.constant 0 : index
    %c0_49 = arith.constant 0 : index
    %93 = vector.load %arg13[%c0_47, %c0_48, %c0_49] : memref<2x1x64xf32, #tpu.memory_space<vmem>>, vector<1x1x64xf32>
    %94 = vector.shape_cast %93 : vector<1x1x64xf32> to vector<1x64xf32>
    %95 = vector.broadcast %94 : vector<1x64xf32> to vector<8x64xf32>
    %96 = arith.addf %92, %95 : vector<8x64xf32>
    %cst_50 = arith.constant 0.000000e+00 : f32
    %97 = vector.broadcast %cst_50 : f32 to vector<8x64xf32>
    %98 = arith.maximumf %96, %97 : vector<8x64xf32>
    %c0_51 = arith.constant 0 : index
    %c0_52 = arith.constant 0 : index
    %c0_53 = arith.constant 0 : index
    %99 = vector.load %arg14[%c0_51, %c0_52, %c0_53] : memref<2x64x32xf32, #tpu.memory_space<vmem>>, vector<1x64x32xf32>
    %100 = vector.shape_cast %99 : vector<1x64x32xf32> to vector<64x32xf32>
    %cst_54 = arith.constant dense<0.000000e+00> : vector<8x32xf32>
    %101 = tpu.matmul %98, %100, %cst_54 {dimension_numbers = #tpu.dot_dimension_numbers<[1], [0], [0], [1], [0, 0, 1, 1], [], []>} : vector<8x64xf32>, vector<64x32xf32>, vector<8x32xf32> -> vector<8x32xf32>
    %c0_55 = arith.constant 0 : index
    %c0_56 = arith.constant 0 : index
    %c0_57 = arith.constant 0 : index
    %102 = vector.load %arg15[%c0_55, %c0_56, %c0_57] : memref<2x1x32xf32, #tpu.memory_space<vmem>>, vector<1x1x32xf32>
    %103 = vector.shape_cast %102 : vector<1x1x32xf32> to vector<1x32xf32>
    %104 = vector.broadcast %103 : vector<1x32xf32> to vector<8x32xf32>
    %105 = arith.addf %101, %104 : vector<8x32xf32>
    %106 = arith.addf %89, %105 : vector<8x32xf32>
    %c0_58 = arith.constant 0 : index
    %c0_59 = arith.constant 0 : index
    %c0_60 = arith.constant 0 : index
    %107 = vector.load %arg16[%c0_58, %c0_59, %c0_60] : memref<2x1x32xf32, #tpu.memory_space<vmem>>, vector<1x1x32xf32>
    %108 = vector.shape_cast %107 : vector<1x1x32xf32> to vector<1x32xf32>
    %c0_61 = arith.constant 0 : index
    %c0_62 = arith.constant 0 : index
    %c0_63 = arith.constant 0 : index
    %109 = vector.load %arg17[%c0_61, %c0_62, %c0_63] : memref<2x1x32xf32, #tpu.memory_space<vmem>>, vector<1x1x32xf32>
    %110 = vector.shape_cast %109 : vector<1x1x32xf32> to vector<1x32xf32>
    %cst_64 = arith.constant dense<0.000000e+00> : vector<8xf32>
    %111 = vector.multi_reduction <add>, %106, %cst_64 [1] : vector<8x32xf32> to vector<8xf32>
    %112 = vector.shape_cast %111 : vector<8xf32> to vector<8x1xf32>
    %cst_65 = arith.constant 3.200000e+01 : f32
    %113 = vector.broadcast %cst_65 : f32 to vector<8x1xf32>
    %114 = arith.divf %112, %113 : vector<8x1xf32>
    %115 = vector.broadcast %114 : vector<8x1xf32> to vector<8x32xf32>
    %116 = arith.subf %106, %115 : vector<8x32xf32>
    %117 = arith.mulf %116, %116 : vector<8x32xf32>
    %cst_66 = arith.constant dense<0.000000e+00> : vector<8xf32>
    %118 = vector.multi_reduction <add>, %117, %cst_66 [1] : vector<8x32xf32> to vector<8xf32>
    %119 = vector.shape_cast %118 : vector<8xf32> to vector<8x1xf32>
    %cst_67 = arith.constant 3.200000e+01 : f32
    %120 = vector.broadcast %cst_67 : f32 to vector<8x1xf32>
    %121 = arith.divf %119, %120 : vector<8x1xf32>
    %122 = vector.broadcast %114 : vector<8x1xf32> to vector<8x32xf32>
    %123 = arith.subf %106, %122 : vector<8x32xf32>
    %cst_68 = arith.constant 9.99999974E-6 : f32
    %124 = vector.broadcast %cst_68 : f32 to vector<8x1xf32>
    %125 = arith.addf %121, %124 : vector<8x1xf32>
    %126 = math.rsqrt %125 : vector<8x1xf32>
    %127 = vector.broadcast %126 : vector<8x1xf32> to vector<8x32xf32>
    %128 = arith.mulf %123, %127 : vector<8x32xf32>
    %129 = vector.broadcast %108 : vector<1x32xf32> to vector<8x32xf32>
    %130 = arith.mulf %128, %129 : vector<8x32xf32>
    %131 = vector.broadcast %110 : vector<1x32xf32> to vector<8x32xf32>
    %132 = arith.addf %130, %131 : vector<8x32xf32>
    %c1 = arith.constant 1 : index
    %c0_69 = arith.constant 0 : index
    %c0_70 = arith.constant 0 : index
    %133 = vector.load %arg6[%c1, %c0_69, %c0_70] : memref<2x32x96xf32, #tpu.memory_space<vmem>>, vector<1x32x96xf32>
    %134 = vector.shape_cast %133 : vector<1x32x96xf32> to vector<32x96xf32>
    %cst_71 = arith.constant dense<0.000000e+00> : vector<8x96xf32>
    %135 = tpu.matmul %132, %134, %cst_71 {dimension_numbers = #tpu.dot_dimension_numbers<[1], [0], [0], [1], [0, 0, 1, 1], [], []>} : vector<8x32xf32>, vector<32x96xf32>, vector<8x96xf32> -> vector<8x96xf32>
    %c1_72 = arith.constant 1 : index
    %c0_73 = arith.constant 0 : index
    %c0_74 = arith.constant 0 : index
    %136 = vector.load %arg7[%c1_72, %c0_73, %c0_74] : memref<2x1x96xf32, #tpu.memory_space<vmem>>, vector<1x1x96xf32>
    %137 = vector.shape_cast %136 : vector<1x1x96xf32> to vector<1x96xf32>
    %138 = vector.broadcast %137 : vector<1x96xf32> to vector<8x96xf32>
    %139 = arith.addf %135, %138 : vector<8x96xf32>
    %140 = vector.extract_strided_slice %139 {offsets = [0, 0], sizes = [8, 32], strides = [1, 1]} : vector<8x96xf32> to vector<8x32xf32>
    %141 = vector.extract_strided_slice %139 {offsets = [0, 32], sizes = [8, 32], strides = [1, 1]} : vector<8x96xf32> to vector<8x32xf32>
    %142 = vector.extract_strided_slice %139 {offsets = [0, 64], sizes = [8, 32], strides = [1, 1]} : vector<8x96xf32> to vector<8x32xf32>
    %143 = vector.extract_strided_slice %140 {offsets = [0, 0], sizes = [8, 16], strides = [1, 1]} : vector<8x32xf32> to vector<8x16xf32>
    %144 = vector.extract_strided_slice %141 {offsets = [0, 0], sizes = [8, 16], strides = [1, 1]} : vector<8x32xf32> to vector<8x16xf32>
    %cst_75 = arith.constant dense<0.000000e+00> : vector<8x8xf32>
    %145 = tpu.matmul %143, %144, %cst_75 {dimension_numbers = #tpu.dot_dimension_numbers<[1], [1], [0], [0], [0, 0, 1, 0], [], []>} : vector<8x16xf32>, vector<8x16xf32>, vector<8x8xf32> -> vector<8x8xf32>
    %146 = arith.addf %145, %4 : vector<8x8xf32>
    %cst_76 = arith.constant dense<0xFF800000> : vector<8xf32>
    %147 = vector.multi_reduction <maximumf>, %146, %cst_76 [1] : vector<8x8xf32> to vector<8xf32>
    %148 = vector.shape_cast %147 : vector<8xf32> to vector<8x1xf32>
    %149 = vector.broadcast %148 : vector<8x1xf32> to vector<8x8xf32>
    %150 = arith.subf %146, %149 : vector<8x8xf32>
    %151 = math.exp %150 : vector<8x8xf32>
    %cst_77 = arith.constant dense<0.000000e+00> : vector<8xf32>
    %152 = vector.multi_reduction <add>, %151, %cst_77 [1] : vector<8x8xf32> to vector<8xf32>
    %153 = vector.shape_cast %152 : vector<8xf32> to vector<8x1xf32>
    %154 = tpu.reciprocal %153 {approx = true} : vector<8x1xf32> -> vector<8x1xf32>
    %155 = vector.broadcast %154 : vector<8x1xf32> to vector<8x8xf32>
    %156 = arith.mulf %151, %155 : vector<8x8xf32>
    %157 = vector.extract_strided_slice %142 {offsets = [0, 0], sizes = [8, 16], strides = [1, 1]} : vector<8x32xf32> to vector<8x16xf32>
    %cst_78 = arith.constant dense<0.000000e+00> : vector<8x16xf32>
    %158 = tpu.matmul %156, %157, %cst_78 {dimension_numbers = #tpu.dot_dimension_numbers<[1], [0], [0], [1], [0, 0, 1, 1], [], []>} : vector<8x8xf32>, vector<8x16xf32>, vector<8x16xf32> -> vector<8x16xf32>
    %159 = vector.extract_strided_slice %140 {offsets = [0, 16], sizes = [8, 16], strides = [1, 1]} : vector<8x32xf32> to vector<8x16xf32>
    %160 = vector.extract_strided_slice %141 {offsets = [0, 16], sizes = [8, 16], strides = [1, 1]} : vector<8x32xf32> to vector<8x16xf32>
    %cst_79 = arith.constant dense<0.000000e+00> : vector<8x8xf32>
    %161 = tpu.matmul %159, %160, %cst_79 {dimension_numbers = #tpu.dot_dimension_numbers<[1], [1], [0], [0], [0, 0, 1, 0], [], []>} : vector<8x16xf32>, vector<8x16xf32>, vector<8x8xf32> -> vector<8x8xf32>
    %162 = arith.addf %161, %4 : vector<8x8xf32>
    %cst_80 = arith.constant dense<0xFF800000> : vector<8xf32>
    %163 = vector.multi_reduction <maximumf>, %162, %cst_80 [1] : vector<8x8xf32> to vector<8xf32>
    %164 = vector.shape_cast %163 : vector<8xf32> to vector<8x1xf32>
    %165 = vector.broadcast %164 : vector<8x1xf32> to vector<8x8xf32>
    %166 = arith.subf %162, %165 : vector<8x8xf32>
    %167 = math.exp %166 : vector<8x8xf32>
    %cst_81 = arith.constant dense<0.000000e+00> : vector<8xf32>
    %168 = vector.multi_reduction <add>, %167, %cst_81 [1] : vector<8x8xf32> to vector<8xf32>
    %169 = vector.shape_cast %168 : vector<8xf32> to vector<8x1xf32>
    %170 = tpu.reciprocal %169 {approx = true} : vector<8x1xf32> -> vector<8x1xf32>
    %171 = vector.broadcast %170 : vector<8x1xf32> to vector<8x8xf32>
    %172 = arith.mulf %167, %171 : vector<8x8xf32>
    %173 = vector.extract_strided_slice %142 {offsets = [0, 16], sizes = [8, 16], strides = [1, 1]} : vector<8x32xf32> to vector<8x16xf32>
    %cst_82 = arith.constant dense<0.000000e+00> : vector<8x16xf32>
    %174 = tpu.matmul %172, %173, %cst_82 {dimension_numbers = #tpu.dot_dimension_numbers<[1], [0], [0], [1], [0, 0, 1, 1], [], []>} : vector<8x8xf32>, vector<8x16xf32>, vector<8x16xf32> -> vector<8x16xf32>
    %175 = tpu.concatenate %158, %174 in 1 : vector<8x16xf32>, vector<8x16xf32> -> vector<8x32xf32>
    %c1_83 = arith.constant 1 : index
    %c0_84 = arith.constant 0 : index
    %c0_85 = arith.constant 0 : index
    %176 = vector.load %arg8[%c1_83, %c0_84, %c0_85] : memref<2x32x32xf32, #tpu.memory_space<vmem>>, vector<1x32x32xf32>
    %177 = vector.shape_cast %176 : vector<1x32x32xf32> to vector<32x32xf32>
    %cst_86 = arith.constant dense<0.000000e+00> : vector<8x32xf32>
    %178 = tpu.matmul %175, %177, %cst_86 {dimension_numbers = #tpu.dot_dimension_numbers<[1], [0], [0], [1], [0, 0, 1, 1], [], []>} : vector<8x32xf32>, vector<32x32xf32>, vector<8x32xf32> -> vector<8x32xf32>
    %c1_87 = arith.constant 1 : index
    %c0_88 = arith.constant 0 : index
    %c0_89 = arith.constant 0 : index
    %179 = vector.load %arg9[%c1_87, %c0_88, %c0_89] : memref<2x1x32xf32, #tpu.memory_space<vmem>>, vector<1x1x32xf32>
    %180 = vector.shape_cast %179 : vector<1x1x32xf32> to vector<1x32xf32>
    %181 = vector.broadcast %180 : vector<1x32xf32> to vector<8x32xf32>
    %182 = arith.addf %178, %181 : vector<8x32xf32>
    %183 = arith.addf %132, %182 : vector<8x32xf32>
    %c1_90 = arith.constant 1 : index
    %c0_91 = arith.constant 0 : index
    %c0_92 = arith.constant 0 : index
    %184 = vector.load %arg10[%c1_90, %c0_91, %c0_92] : memref<2x1x32xf32, #tpu.memory_space<vmem>>, vector<1x1x32xf32>
    %185 = vector.shape_cast %184 : vector<1x1x32xf32> to vector<1x32xf32>
    %c1_93 = arith.constant 1 : index
    %c0_94 = arith.constant 0 : index
    %c0_95 = arith.constant 0 : index
    %186 = vector.load %arg11[%c1_93, %c0_94, %c0_95] : memref<2x1x32xf32, #tpu.memory_space<vmem>>, vector<1x1x32xf32>
    %187 = vector.shape_cast %186 : vector<1x1x32xf32> to vector<1x32xf32>
    %cst_96 = arith.constant dense<0.000000e+00> : vector<8xf32>
    %188 = vector.multi_reduction <add>, %183, %cst_96 [1] : vector<8x32xf32> to vector<8xf32>
    %189 = vector.shape_cast %188 : vector<8xf32> to vector<8x1xf32>
    %cst_97 = arith.constant 3.200000e+01 : f32
    %190 = vector.broadcast %cst_97 : f32 to vector<8x1xf32>
    %191 = arith.divf %189, %190 : vector<8x1xf32>
    %192 = vector.broadcast %191 : vector<8x1xf32> to vector<8x32xf32>
    %193 = arith.subf %183, %192 : vector<8x32xf32>
    %194 = arith.mulf %193, %193 : vector<8x32xf32>
    %cst_98 = arith.constant dense<0.000000e+00> : vector<8xf32>
    %195 = vector.multi_reduction <add>, %194, %cst_98 [1] : vector<8x32xf32> to vector<8xf32>
    %196 = vector.shape_cast %195 : vector<8xf32> to vector<8x1xf32>
    %cst_99 = arith.constant 3.200000e+01 : f32
    %197 = vector.broadcast %cst_99 : f32 to vector<8x1xf32>
    %198 = arith.divf %196, %197 : vector<8x1xf32>
    %199 = vector.broadcast %191 : vector<8x1xf32> to vector<8x32xf32>
    %200 = arith.subf %183, %199 : vector<8x32xf32>
    %cst_100 = arith.constant 9.99999974E-6 : f32
    %201 = vector.broadcast %cst_100 : f32 to vector<8x1xf32>
    %202 = arith.addf %198, %201 : vector<8x1xf32>
    %203 = math.rsqrt %202 : vector<8x1xf32>
    %204 = vector.broadcast %203 : vector<8x1xf32> to vector<8x32xf32>
    %205 = arith.mulf %200, %204 : vector<8x32xf32>
    %206 = vector.broadcast %185 : vector<1x32xf32> to vector<8x32xf32>
    %207 = arith.mulf %205, %206 : vector<8x32xf32>
    %208 = vector.broadcast %187 : vector<1x32xf32> to vector<8x32xf32>
    %209 = arith.addf %207, %208 : vector<8x32xf32>
    %c1_101 = arith.constant 1 : index
    %c0_102 = arith.constant 0 : index
    %c0_103 = arith.constant 0 : index
    %210 = vector.load %arg12[%c1_101, %c0_102, %c0_103] : memref<2x32x64xf32, #tpu.memory_space<vmem>>, vector<1x32x64xf32>
    %211 = vector.shape_cast %210 : vector<1x32x64xf32> to vector<32x64xf32>
    %cst_104 = arith.constant dense<0.000000e+00> : vector<8x64xf32>
    %212 = tpu.matmul %209, %211, %cst_104 {dimension_numbers = #tpu.dot_dimension_numbers<[1], [0], [0], [1], [0, 0, 1, 1], [], []>} : vector<8x32xf32>, vector<32x64xf32>, vector<8x64xf32> -> vector<8x64xf32>
    %c1_105 = arith.constant 1 : index
    %c0_106 = arith.constant 0 : index
    %c0_107 = arith.constant 0 : index
    %213 = vector.load %arg13[%c1_105, %c0_106, %c0_107] : memref<2x1x64xf32, #tpu.memory_space<vmem>>, vector<1x1x64xf32>
    %214 = vector.shape_cast %213 : vector<1x1x64xf32> to vector<1x64xf32>
    %215 = vector.broadcast %214 : vector<1x64xf32> to vector<8x64xf32>
    %216 = arith.addf %212, %215 : vector<8x64xf32>
    %cst_108 = arith.constant 0.000000e+00 : f32
    %217 = vector.broadcast %cst_108 : f32 to vector<8x64xf32>
    %218 = arith.maximumf %216, %217 : vector<8x64xf32>
    %c1_109 = arith.constant 1 : index
    %c0_110 = arith.constant 0 : index
    %c0_111 = arith.constant 0 : index
    %219 = vector.load %arg14[%c1_109, %c0_110, %c0_111] : memref<2x64x32xf32, #tpu.memory_space<vmem>>, vector<1x64x32xf32>
    %220 = vector.shape_cast %219 : vector<1x64x32xf32> to vector<64x32xf32>
    %cst_112 = arith.constant dense<0.000000e+00> : vector<8x32xf32>
    %221 = tpu.matmul %218, %220, %cst_112 {dimension_numbers = #tpu.dot_dimension_numbers<[1], [0], [0], [1], [0, 0, 1, 1], [], []>} : vector<8x64xf32>, vector<64x32xf32>, vector<8x32xf32> -> vector<8x32xf32>
    %c1_113 = arith.constant 1 : index
    %c0_114 = arith.constant 0 : index
    %c0_115 = arith.constant 0 : index
    %222 = vector.load %arg15[%c1_113, %c0_114, %c0_115] : memref<2x1x32xf32, #tpu.memory_space<vmem>>, vector<1x1x32xf32>
    %223 = vector.shape_cast %222 : vector<1x1x32xf32> to vector<1x32xf32>
    %224 = vector.broadcast %223 : vector<1x32xf32> to vector<8x32xf32>
    %225 = arith.addf %221, %224 : vector<8x32xf32>
    %226 = arith.addf %209, %225 : vector<8x32xf32>
    %c1_116 = arith.constant 1 : index
    %c0_117 = arith.constant 0 : index
    %c0_118 = arith.constant 0 : index
    %227 = vector.load %arg16[%c1_116, %c0_117, %c0_118] : memref<2x1x32xf32, #tpu.memory_space<vmem>>, vector<1x1x32xf32>
    %228 = vector.shape_cast %227 : vector<1x1x32xf32> to vector<1x32xf32>
    %c1_119 = arith.constant 1 : index
    %c0_120 = arith.constant 0 : index
    %c0_121 = arith.constant 0 : index
    %229 = vector.load %arg17[%c1_119, %c0_120, %c0_121] : memref<2x1x32xf32, #tpu.memory_space<vmem>>, vector<1x1x32xf32>
    %230 = vector.shape_cast %229 : vector<1x1x32xf32> to vector<1x32xf32>
    %cst_122 = arith.constant dense<0.000000e+00> : vector<8xf32>
    %231 = vector.multi_reduction <add>, %226, %cst_122 [1] : vector<8x32xf32> to vector<8xf32>
    %232 = vector.shape_cast %231 : vector<8xf32> to vector<8x1xf32>
    %cst_123 = arith.constant 3.200000e+01 : f32
    %233 = vector.broadcast %cst_123 : f32 to vector<8x1xf32>
    %234 = arith.divf %232, %233 : vector<8x1xf32>
    %235 = vector.broadcast %234 : vector<8x1xf32> to vector<8x32xf32>
    %236 = arith.subf %226, %235 : vector<8x32xf32>
    %237 = arith.mulf %236, %236 : vector<8x32xf32>
    %cst_124 = arith.constant dense<0.000000e+00> : vector<8xf32>
    %238 = vector.multi_reduction <add>, %237, %cst_124 [1] : vector<8x32xf32> to vector<8xf32>
    %239 = vector.shape_cast %238 : vector<8xf32> to vector<8x1xf32>
    %cst_125 = arith.constant 3.200000e+01 : f32
    %240 = vector.broadcast %cst_125 : f32 to vector<8x1xf32>
    %241 = arith.divf %239, %240 : vector<8x1xf32>
    %242 = vector.broadcast %234 : vector<8x1xf32> to vector<8x32xf32>
    %243 = arith.subf %226, %242 : vector<8x32xf32>
    %cst_126 = arith.constant 9.99999974E-6 : f32
    %244 = vector.broadcast %cst_126 : f32 to vector<8x1xf32>
    %245 = arith.addf %241, %244 : vector<8x1xf32>
    %246 = math.rsqrt %245 : vector<8x1xf32>
    %247 = vector.broadcast %246 : vector<8x1xf32> to vector<8x32xf32>
    %248 = arith.mulf %243, %247 : vector<8x32xf32>
    %249 = vector.broadcast %228 : vector<1x32xf32> to vector<8x32xf32>
    %250 = arith.mulf %248, %249 : vector<8x32xf32>
    %251 = vector.broadcast %230 : vector<1x32xf32> to vector<8x32xf32>
    %252 = arith.addf %250, %251 : vector<8x32xf32>
    %c0_127 = arith.constant 0 : index
    %c0_128 = arith.constant 0 : index
    %253 = vector.load %arg18[%c0_127, %c0_128] : memref<1x32xf32, #tpu.memory_space<vmem>>, vector<1x32xf32>
    %254 = vector.broadcast %253 : vector<1x32xf32> to vector<8x32xf32>
    %255 = arith.mulf %252, %254 : vector<8x32xf32>
    %cst_129 = arith.constant dense<0.000000e+00> : vector<8xf32>
    %256 = vector.multi_reduction <add>, %255, %cst_129 [1] : vector<8x32xf32> to vector<8xf32>
    %257 = vector.shape_cast %256 : vector<8xf32> to vector<8x1xf32>
    %c0_130 = arith.constant 0 : index
    %c0_131 = arith.constant 0 : index
    %258 = vector.load %arg19[%c0_130, %c0_131] : memref<1x1xf32, #tpu.memory_space<vmem>>, vector<1x1xf32>
    %259 = vector.broadcast %258 : vector<1x1xf32> to vector<8x1xf32>
    %260 = arith.addf %257, %259 : vector<8x1xf32>
    %c0_132 = arith.constant 0 : index
    %c0_133 = arith.constant 0 : index
    %c0_134 = arith.constant 0 : index
    %261 = vector.load %arg20[%c0_132, %c0_133, %c0_134] : memref<1x8x1xf32, #tpu.memory_space<vmem>>, vector<1x8x1xf32>
    %262 = vector.shape_cast %261 : vector<1x8x1xf32> to vector<8x1xf32>
    %263 = vector.shape_cast %260 : vector<8x1xf32> to vector<1x8x1xf32>
    tpu.vector_store %arg20[%c0_132, %c0_133, %c0_134], %263 {strides = array<i32>} : memref<1x8x1xf32, #tpu.memory_space<vmem>>, vector<1x8x1xf32>,
    return
  }
  func.func @transform_0(%arg0: i32) -> (i32, i32, i32) {
    %c0_i32 = arith.constant 0 : i32
    %c0_i32_0 = arith.constant 0 : i32
    %c0_i32_1 = arith.constant 0 : i32
    return %arg0, %c0_i32, %c0_i32_0 : i32, i32, i32
  }
  func.func @transform_1(%arg0: i32) -> (i32, i32) {
    %c0_i32 = arith.constant 0 : i32
    %c0_i32_0 = arith.constant 0 : i32
    %c0_i32_1 = arith.constant 0 : i32
    return %c0_i32, %c0_i32_0 : i32, i32
  }
  func.func @transform_2(%arg0: i32) -> (i32, i32, i32) {
    %c0_i32 = arith.constant 0 : i32
    %c0_i32_0 = arith.constant 0 : i32
    %c0_i32_1 = arith.constant 0 : i32
    return %arg0, %c0_i32, %c0_i32_0 : i32, i32, i32
  }
  func.func @transform_3(%arg0: i32) -> (i32, i32) {
    %c0_i32 = arith.constant 0 : i32
    %c0_i32_0 = arith.constant 0 : i32
    %c0_i32_1 = arith.constant 0 : i32
    return %c0_i32, %c0_i32_0 : i32, i32
  }
  func.func @transform_4(%arg0: i32) -> (i32, i32) {
    %c0_i32 = arith.constant 0 : i32
    %c0_i32_0 = arith.constant 0 : i32
    %c0_i32_1 = arith.constant 0 : i32
    return %c0_i32, %c0_i32_0 : i32, i32
  }
  func.func @transform_5(%arg0: i32) -> (i32, i32, i32) {
    %c0_i32 = arith.constant 0 : i32
    %c0_i32_0 = arith.constant 0 : i32
    %c0_i32_1 = arith.constant 0 : i32
    %c0_i32_2 = arith.constant 0 : i32
    return %c0_i32, %c0_i32_0, %c0_i32_1 : i32, i32, i32
  }
  func.func @transform_6(%arg0: i32) -> (i32, i32, i32) {
    %c0_i32 = arith.constant 0 : i32
    %c0_i32_0 = arith.constant 0 : i32
    %c0_i32_1 = arith.constant 0 : i32
    %c0_i32_2 = arith.constant 0 : i32
    return %c0_i32, %c0_i32_0, %c0_i32_1 : i32, i32, i32
  }
  func.func @transform_7(%arg0: i32) -> (i32, i32, i32) {
    %c0_i32 = arith.constant 0 : i32
    %c0_i32_0 = arith.constant 0 : i32
    %c0_i32_1 = arith.constant 0 : i32
    %c0_i32_2 = arith.constant 0 : i32
    return %c0_i32, %c0_i32_0, %c0_i32_1 : i32, i32, i32
  }
  func.func @transform_8(%arg0: i32) -> (i32, i32, i32) {
    %c0_i32 = arith.constant 0 : i32
    %c0_i32_0 = arith.constant 0 : i32
    %c0_i32_1 = arith.constant 0 : i32
    %c0_i32_2 = arith.constant 0 : i32
    return %c0_i32, %c0_i32_0, %c0_i32_1 : i32, i32, i32
  }
  func.func @transform_9(%arg0: i32) -> (i32, i32, i32) {
    %c0_i32 = arith.constant 0 : i32
    %c0_i32_0 = arith.constant 0 : i32
    %c0_i32_1 = arith.constant 0 : i32
    %c0_i32_2 = arith.constant 0 : i32
    return %c0_i32, %c0_i32_0, %c0_i32_1 : i32, i32, i32
  }
  func.func @transform_10(%arg0: i32) -> (i32, i32, i32) {
    %c0_i32 = arith.constant 0 : i32
    %c0_i32_0 = arith.constant 0 : i32
    %c0_i32_1 = arith.constant 0 : i32
    %c0_i32_2 = arith.constant 0 : i32
    return %c0_i32, %c0_i32_0, %c0_i32_1 : i32, i32, i32
  }
  func.func @transform_11(%arg0: i32) -> (i32, i32, i32) {
    %c0_i32 = arith.constant 0 : i32
    %c0_i32_0 = arith.constant 0 : i32
    %c0_i32_1 = arith.constant 0 : i32
    %c0_i32_2 = arith.constant 0 : i32
    return %c0_i32, %c0_i32_0, %c0_i32_1 : i32, i32, i32
  }
  func.func @transform_12(%arg0: i32) -> (i32, i32, i32) {
    %c0_i32 = arith.constant 0 : i32
    %c0_i32_0 = arith.constant 0 : i32
    %c0_i32_1 = arith.constant 0 : i32
    %c0_i32_2 = arith.constant 0 : i32
    return %c0_i32, %c0_i32_0, %c0_i32_1 : i32, i32, i32
  }
  func.func @transform_13(%arg0: i32) -> (i32, i32, i32) {
    %c0_i32 = arith.constant 0 : i32
    %c0_i32_0 = arith.constant 0 : i32
    %c0_i32_1 = arith.constant 0 : i32
    %c0_i32_2 = arith.constant 0 : i32
    return %c0_i32, %c0_i32_0, %c0_i32_1 : i32, i32, i32
  }
  func.func @transform_14(%arg0: i32) -> (i32, i32, i32) {
    %c0_i32 = arith.constant 0 : i32
    %c0_i32_0 = arith.constant 0 : i32
    %c0_i32_1 = arith.constant 0 : i32
    %c0_i32_2 = arith.constant 0 : i32
    return %c0_i32, %c0_i32_0, %c0_i32_1 : i32, i32, i32
  }
  func.func @transform_15(%arg0: i32) -> (i32, i32, i32) {
    %c0_i32 = arith.constant 0 : i32
    %c0_i32_0 = arith.constant 0 : i32
    %c0_i32_1 = arith.constant 0 : i32
    %c0_i32_2 = arith.constant 0 : i32
    return %c0_i32, %c0_i32_0, %c0_i32_1 : i32, i32, i32
  }
  func.func @transform_16(%arg0: i32) -> (i32, i32, i32) {
    %c0_i32 = arith.constant 0 : i32
    %c0_i32_0 = arith.constant 0 : i32
    %c0_i32_1 = arith.constant 0 : i32
    %c0_i32_2 = arith.constant 0 : i32
    return %c0_i32, %c0_i32_0, %c0_i32_1 : i32, i32, i32
  }
  func.func @transform_17(%arg0: i32) -> (i32, i32) {
    %c0_i32 = arith.constant 0 : i32
    %c0_i32_0 = arith.constant 0 : i32
    %c0_i32_1 = arith.constant 0 : i32
    return %c0_i32, %c0_i32_0 : i32, i32
  }
  func.func @transform_18(%arg0: i32) -> (i32, i32) {
    %c0_i32 = arith.constant 0 : i32
    %c0_i32_0 = arith.constant 0 : i32
    %c0_i32_1 = arith.constant 0 : i32
    return %c0_i32, %c0_i32_0 : i32, i32
  }
  func.func @transform_19(%arg0: i32) -> (i32, i32, i32) {
    %c0_i32 = arith.constant 0 : i32
    %c0_i32_0 = arith.constant 0 : i32
    %c0_i32_1 = arith.constant 0 : i32
    return %arg0, %c0_i32, %c0_i32_0 : i32, i32, i32
  }
}

</mosaic_0001>

<bundles_post_ra>
// kernel: transformer_forward.1
= control target key start
LH: loop header
LB: loop body
LE: loop exit
PB: predicated region body
PF: predicated region fallthrough
CT: control target
= control target key end

     0   :  { %s2725_s20 = smov 0   ;;  %s3055_s0 = inlined_call_operand.vmem [shape: f32[2,8,1], index: 0, kind: input, shape index: {}]   ;;  %s3056_s1 = inlined_call_operand.vmem [shape: f32[8,32], index: 1, kind: input, shape index: {}]   ;;  %s3057_s2 = inlined_call_operand.vmem [shape: f32[2,8,8], index: 2, kind: input, shape index: {}]   ;;  %s3058_s3 = inlined_call_operand.vmem [shape: f32[1,32], index: 3, kind: input, shape index: {}]   ;;  %s3059_s4 = inlined_call_operand.vmem [shape: f32[1,32], index: 4, kind: input, shape index: {}]   ;;  %s3060_s5 = inlined_call_operand.vmem [shape: f32[2,32,96], index: 5, kind: input, shape index: {}]   ;;  %s3061_s6 = inlined_call_operand.vmem [shape: f32[2,1,96], index: 6, kind: input, shape index: {}]   ;;  %s3062_s7 = inlined_call_operand.vmem [shape: f32[2,32,32], index: 7, kind: input, shape index: {}]   ;;  %s3063_s8 = inlined_call_operand.vmem [shape: f32[2,1,32], index: 8, kind: input, shape index: {}]   ;;  %s3064_s9 = inlined_call_operand.vmem [shape: f32[2,1,32], index: 9, kind: input, shape index: {}]   ;;  %s3065_s10 = inlined_call_operand.vmem [shape: f32[2,1,32], index: 10, kind: input, shape index: {}]   ;;  %s3066_s11 = inlined_call_operand.vmem [shape: f32[2,32,64], index: 11, kind: input, shape index: {}]   ;;  %s3067_s12 = inlined_call_operand.vmem [shape: f32[2,1,64], index: 12, kind: input, shape index: {}]   ;;  %s3068_s13 = inlined_call_operand.vmem [shape: f32[2,64,32], index: 13, kind: input, shape index: {}]   ;;  %s3069_s14 = inlined_call_operand.vmem [shape: f32[2,1,32], index: 14, kind: input, shape index: {}]   ;;  %s3070_s15 = inlined_call_operand.vmem [shape: f32[2,1,32], index: 15, kind: input, shape index: {}]   ;;  %s3071_s16 = inlined_call_operand.vmem [shape: f32[2,1,32], index: 16, kind: input, shape index: {}]   ;;  %s3072_s17 = inlined_call_operand.vmem [shape: f32[1,32], index: 17, kind: input, shape index: {}]   ;;  %s3073_s18 = inlined_call_operand.<no memory space> [shape: f32[1,1], index: 18, kind: input, shape index: {}]   ;;  %s3074_s19 = inlined_call_operand.vmem [shape: f32[2,8,1], index: 19, kind: output, shape index: {}]  }
   0x1   :  { %3076 = sst [smem:[#allocation3_spill]] %s3055_s0  ;;  %v24_v0 = vstv %s3073_s18 }
   0x2   :  { %3077 = sst [smem:[#allocation4_spill]] %s3056_s1  ;;  %25 = vst [vmem:[#allocation2] sm:$0x1] %v24_v0 }
   0x3   :  { %3078 = sst [smem:[#allocation5_spill]] %s3057_s2 }
   0x4   :  { %3079 = sst [smem:[#allocation6_spill]] %s3058_s3 }
   0x5 LB: > { %s2215_s21 = sadd.s32 4294967295, %s2610_s20   ;;  %p2219_p0 = scmp.ge.s32.totalorder %s2610_s20, 1  ;;  %s2610_s20 = sphi %s2725_s20, %s31_s20  }
   0x6   : > { %p547_p1 = scmp.lt.s32.totalorder %s2610_s20, 3 }
   0x8   : > { %p548_p2 = pnand %p2219_p0, %p547_p1 }
   0x9   : > { %p605_p3 = scmp.lt.s32.totalorder (!%p548_p2), %s2215_s21, 1  ;;  %v642_v1 = vld [vmem:[%s3060_s5] sm:$0xff] (!%p548_p2)  ;;  %v643_v2 = vld [vmem:[%s3060_s5 + $0x8] sm:$0xff] (!%p548_p2)  ;;  %v2612_v3 = vmov (!%p548_p2), 0   ;;  %v2613_v4 = vmov (!%p548_p2), 0.0|0.0   ;;  %s3080_s3 = sld [smem:[#allocation3_spill]] (!%p548_p2) }
   0xa   : > { %551 = sbr.rel (%p548_p2) target bundleno = 5235 (0x1473), region = 96  ;;  %2579 = vset.pattern.permute.xlu0 (!%p548_p2), %v2612_v3  ;;  %2501 = vmatprep.subr.bf16.mxu1 (!%p548_p2), %v2613_v4  ;;  %v2502_v5 = vpack.c.bf16 (!%p548_p2), %v643_v2, %v642_v1  ;;  %v644_v7 = vld [vmem:[%s3060_s5 + $0x10] sm:$0xff] (!%p548_p2)  ;;  %v645_v8 = vld [vmem:[%s3060_s5 + $0x18] sm:$0xff] (!%p548_p2)  ;;  %vm2614_vm0 = vmmov (!%p548_p2), 0   ;;  %v2615_v10 = vmov (!%p548_p2), 0.0   ;;  %s3081_s1 = sld [smem:[#allocation6_spill]] (!%p548_p2) }
   0xb   : > { %v2505_v9 = vpack.c.bf16 (!%p548_p2), %v645_v8, %v644_v7  ;;  %2365 = vmatprep.mubr.msk.f32.mxu1 (!%p548_p2), %vm2614_vm0, %v2615_v10  ;;  %2378 = vmatprep.subr.mxu0 (!%p548_p2), %v2615_v10  ;;  %v2224_v12 = vld [vmem:[%s3059_s4] ss:$0 sm:$0xff] (!%p548_p2)  ;;  %s3082_s25 = sld [smem:[#allocation4_spill]] (!%p548_p2)  ;;  %vm653_vm1 = vcmask (!%p548_p2), 261120   ;;  %s2616_s27 = smov (!%p548_p2), 80   ;;  %vm730_vm2 = vcmask (!%p548_p2), 130048  }
   0xc   : > { %2503 = vmatpush3.bf16.msra.mxu1 (!%p548_p2), %v2502_v5  ;;  %2380 = vmatprep.mubr.msk.f32.mxu0 (!%p548_p2), %vm2614_vm0, %v2615_v10  ;;  %v2225_v18 = vld [vmem:[%s3061_s6] ss:$0 sm:$0xff] (!%p548_p2)  ;;  %s2617_s28 = smov (!%p548_p2), 96   ;;  %s2618_s29 = smov (!%p548_p2), 112   ;;  %vm805_vm3 = vcmask (!%p548_p2), 64512   ;;  %v1064_v53 = vld [vmem:[%s3062_s7 + $0x8] sm:$0xff] (!%p548_p2) }
   0xd   : > { %2504 = vmatprep.subr.bf16.mxu1 (!%p548_p2), %v2613_v4  ;;  %s2619_s22 = smov (!%p548_p2), 64   ;;  %s2620_s18 = smov (!%p548_p2), 48   ;;  %v1063_v52 = vld [vmem:[%s3062_s7] sm:$0xff] (!%p548_p2)  ;;  %v1065_v54 = vld [vmem:[%s3062_s7 + $0x10] sm:$0xff] (!%p548_p2)  ;;  %v1066_v56 = vld [vmem:[%s3062_s7 + $0x18] sm:$0xff] (!%p548_p2)  ;;  %vm1278_vm4 = vcmask (!%p548_p2), 523264  }
   0xe   : > { %v2508_v55 = vpack.c.bf16 (!%p548_p2), %v1064_v53, %v1063_v52  ;;  %v2511_v57 = vpack.c.bf16 (!%p548_p2), %v1066_v56, %v1065_v54  ;;  %v2233_v0 = vld [vmem:[%s3063_s8] ss:$0 sm:$0xff] (!%p548_p2)  ;;  %vm2148_vm5 = vcmask (!%p548_p2), 7168  }
  0x10   : > { %2506 = vmatpush3.bf16.msra.mxu1 (!%p548_p2), %v2505_v9  ;;  %v2223_v11 = vld [vmem:[%s3081_s1] ss:$0 sm:$0xff] (!%p548_p2) }
  0x11   : > { %s3086_s21 = smov (!%p605_p3, %s2215_s21), 1  ;;  %2368 = vmatprep.subr.mxu1 %v2615_v10  ;;  %v618_v15 = vld [vmem:[%s3082_s25] sm:$0xff] }
  0x12   : > { %s2740_s23 = sshll.u32 %s3086_s21, 3  ;;  %s3083_s21 = sld [smem:[#allocation5_spill]] }
  0x13   : > { %s608_s26 = scalar_lea.vmem %s3080_s3, %s2740_s23 }
  0x14   : > { %v617_v6 = vld [vmem:[%s608_s26] sm:$0xff] }
  0x15   : > { %623 = vperm.xlu0 %2579, %v617_v6  }
  0x18   : > { %s612_s1 = scalar_lea.vmem %s3083_s21, %s2740_s23  ;;  %s616_s21 = scalar_lea.vmem %s3074_s19, %s2740_s23 }
  0x19   : > { %v2794_v25 = vld [vmem:[%s612_s1] sm:$0xff]  ;;  %s3075_s1 = smov 16  }
  0x94   : > { %v624_v13 = vpop.permute.xlu0 %623 }
  0x95   : > { %v632_v14 = vmul.f32 %v2223_v11, %v624_v13  ;;  %v1178_v13 = vld [vmem:[%s3066_s11] sm:$0xff] }
  0x97   : > { %v640_v16 = vadd.f32 %v2224_v12, %v632_v14  ;;  %v1179_v14 = vld [vmem:[%s3066_s11 + $0x8] sm:$0xff] }
  0x99   : > { %v2768_v17 = vadd.f32 %v640_v16, %v618_v15  ;;  %v2514_v15 = vpack.c.bf16 %v1179_v14, %v1178_v13  ;;  %v1180_v16 = vld [vmem:[%s3066_s11 + $0x10] sm:$0xff] }
  0x9b   : > { %2366 = vmatmul.mubr.msk.f32.vlgmr.msra.gmra.mrb[0].mxu1 %vm653_vm1, %v2768_v17 }
  0x9c   : > { %2370 = vmatprep.mubr.msk.f32.mxu1 %vm2614_vm0, %v2615_v10 }
 0x16e   : > { %v723_v19 = vpop.f32.mrb[0].mxu1 }
 0x16f   : > { %v724_v20 = vadd.f32 %v2225_v18, %v723_v19  ;;  %v2367_v21 = vpop.f32.mrb[1].mxu1  ;;  %v1263_v19 = vld [vmem:[%s3068_s13] sm:$0xff] }
 0x170   : > { %v1265_v21 = vld [vmem:[%s3068_s13 + $0x10] sm:$0xff] }
 0x171   : > { %895 = vrot.lane.b32.xlu1 %v724_v20, %s2616_s27  ;;  %728 = vrot.lane.b32.xlu0 %v724_v20, %s2617_s28 }
 0x175   : > { %893 = vrot.lane.b32.xlu1 %v724_v20, %s2618_s29 }
 0x1e3   : > { %v896_v22 = vpop.permute.xlu1 %895  ;;  %v729_v23 = vpop.permute.xlu0 %728 }
 0x1e4   : > { %2369 = vmatpush3.xpose.msk.msra.mxu1 %vm730_vm2, %v729_v23  ;;  %2379 = vmatpush3.xpose.msk.msra.mxu0 %vm730_vm2, %v896_v22  ;;  %v1266_v23 = vld [vmem:[%s3068_s13 + $0x18] sm:$0xff] }
 0x1e5   : > { %2373 = vmatprep.subr.mxu1 %v2615_v10  ;;  %2507 = vmatprep.subr.bf16.mxu0 %v2613_v4 }
 0x1e7   : > { %v894_v24 = vpop.permute.xlu1 %893  ;;  %2371 = vmatmul.mubr.msk.f32.vlgmr.msra.gmra.mrb[2].mxu1 %vm730_vm2, %v724_v20 }
 0x1e8   : > { %2381 = vmatmul.mubr.msk.f32.vlgmr.msra.gmra.mrb[0].mxu0 %vm730_vm2, %v894_v24  ;;  %2375 = vmatprep.mubr.msk.f32.mxu1 %vm2614_vm0, %v2615_v10  ;;  %v2523_v24 = vpack.c.bf16 %v1266_v23, %v1265_v21 }
 0x1e9   : > { %2396 = vmatprep.mubr.msk.f32.mxu0 %vm2614_vm0, %v2615_v10  ;;  %2509 = vmatpush3.bf16.msra.mxu0 %v2508_v55 }
 0x1ea   : > { %2510 = vmatprep.subr.bf16.mxu0 %v2613_v4 }
 0x1ed   : > { %2512 = vmatpush3.bf16.msra.mxu0 %v2511_v57  ;;  %v2243_v57 = vld [vmem:[%s3060_s5 + $0x20] sm:$0xff] }
 0x1ee   : > { %2519 = vmatprep.subr.bf16.mxu0 %v2613_v4 }
 0x2ba   : > { %v801_v26 = vpop.f32.mrb[2].mxu1 }
 0x2bb   : > { %v802_v27 = vadd.f32 %v801_v26, %v2794_v25  ;;  %v2372_v28 = vpop.f32.mrb[3].mxu1  ;;  %v967_v29 = vpop.f32.mrb[0].mxu0  ;;  %v1267_v26 = vld [vmem:[%s3068_s13 + $0x20] sm:$0xff] }
 0x2bc   : > { %v968_v30 = vadd.f32 %v967_v29, %v2794_v25  ;;  %v2382_v31 = vpop.f32.mrb[1].mxu0 }
 0x2bd   : > { %v806_v32 = vsel %vm805_vm3, %v802_v27, -inf }
 0x2be   : > { %807 = vmax.xlane.f32.xlu0 %v806_v32  ;;  %v971_v33 = vsel %vm805_vm3, %v968_v30, -inf }
 0x2bf   : > { %972 = vmax.xlane.f32.xlu1 %v971_v33  ;;  %v2235_v33 = vld [vmem:[%s3064_s9] ss:$0 sm:$0xff] }
 0x2d0   : > { %817 = vrot.lane.b32.xlu1 %v724_v20, %s2619_s22 }
 0x34b   : > { %v808_v34 = vpop.xlane.xlu0 %807 }
 0x34c   : > { %v809_v35 = vsub.f32 %v802_v27, %v808_v34  ;;  %v973_v36 = vpop.xlane.xlu1 %972  ;;  %v1268_v27 = vld [vmem:[%s3068_s13 + $0x28] sm:$0xff] }
 0x34d   : > { %v974_v37 = vsub.f32 %v968_v30, %v973_v36  ;;  %v2526_v28 = vpack.c.bf16 %v1268_v27, %v1267_v26 }
 0x34e   : > { %v810_v38 = vmul.f32 1.442695, %v809_v35  ;;  %v2236_v35 = vld [vmem:[%s3065_s10] ss:$0 sm:$0xff] }
 0x34f   : > { %v975_v39 = vmul.f32 1.442695, %v974_v37 }
 0x350   : > { %2580 = vpow2.f32 %v810_v38  ;;  %v818_v40 = vpop.permute.xlu1 %817  ;;  %v1269_v38 = vld [vmem:[%s3068_s13 + $0x30] sm:$0xff] }
 0x351   : > { %2374 = vmatpush3.msra.mxu1 %v818_v40  ;;  %2582 = vpow2.f32 %v975_v39  ;;  %v1270_v39 = vld [vmem:[%s3068_s13 + $0x38] sm:$0xff] }
 0x352   : > { %2383 = vmatprep.subr.mxu1 %v2615_v10  ;;  %v2529_v40 = vpack.c.bf16 %v1270_v39, %v1269_v38 }
 0x35a   : > { %v2581_v41 = vpop.eup %2580 }
 0x35b   : > { %v812_v42 = vsel %vm805_vm3, %v2581_v41, 0.0  ;;  %v2583_v43 = vpop.eup %2582 }
 0x35c   : > { %813 = vadd.xlane.f32.xlu0 %v812_v42  ;;  %v977_v44 = vsel %vm805_vm3, %v2583_v43, 0.0 }
 0x360   : > { %978 = vadd.xlane.f32.xlu0 %v977_v44 }
 0x376   : > { %982 = vrot.lane.b32.xlu0 %v724_v20, %s2620_s18  ;;  %v1264_v20 = vld [vmem:[%s3068_s13 + $0x8] sm:$0xff] }
 0x377   : > { %v2520_v22 = vpack.c.bf16 %v1264_v20, %v1263_v19 }
 0x3e9   : > { %v814_v45 = vpop.xlane.xlu0 %813 }
 0x3ea   : > { %2584 = vrcp.f32 %v814_v45 }
 0x3ed   : > { %v979_v46 = vpop.xlane.xlu0 %978 }
 0x3ee   : > { %2586 = vrcp.f32 %v979_v46  ;;  %v2239_v46 = vld [vmem:[%s3069_s14] ss:$0 sm:$0xff] }
 0x3f1   : > { %v983_v49 = vpop.permute.xlu0 %982 }
 0x3f4   : > { %v2585_v47 = vpop.eup %2584 }
 0x3f5   : > { %v816_v48 = vmul.f32 %v2585_v47, %v2581_v41  ;;  %v2237_v41 = vld [vmem:[%s3067_s12] ss:$0 sm:$0xff] }
 0x3f7   : > { %2376 = vmatmul.mubr.msk.f32.vlgmr.msra.gmra.mrb[4].mxu1 %vm805_vm3, %v816_v48 }
 0x3f8   : > { %v2587_v50 = vpop.eup %2586  ;;  %2384 = vmatpush3.msra.mxu1 %v983_v49  ;;  %2385 = vmatprep.mubr.msk.f32.mxu1 %vm2614_vm0, %v2615_v10 }
 0x3f9   : > { %v981_v51 = vmul.f32 %v2587_v50, %v2583_v43  ;;  %2513 = vmatprep.subr.bf16.mxu1 %v2613_v4 }
 0x3fb   : > { %2386 = vmatmul.mubr.msk.f32.vlgmr.msra.gmra.mrb[6].mxu1 %vm805_vm3, %v981_v51 }
 0x3fc   : > { %2407 = vmatprep.mubr.msk.f32.mxu1 %vm2614_vm0, %v2615_v10  ;;  %2515 = vmatpush3.bf16.msra.mxu1 %v2514_v15 }
 0x3fd   : > { %2516 = vmatprep.subr.bf16.mxu1 %v2613_v4 }
 0x4ca   : > { %v889_v58 = vpop.f32.mrb[4].mxu1 }
 0x4cb   : > { %v2377_v59 = vpop.f32.mrb[5].mxu1 }
 0x4ce   : > { %v1054_v60 = vpop.f32.mrb[6].mxu1 }
 0x4cf   : > { %1059 = vrot.lane.b32.xlu1 %v1054_v60, %s3075_s1  ;;  %v2387_v61 = vpop.f32.mrb[7].mxu1  ;;  %v2245_v60 = vld [vmem:[%s3060_s5 + $0x30] sm:$0xff]  ;;  %s3084_s1 = smov 16  }
 0x4d0   : > { %v2246_v61 = vld [vmem:[%s3060_s5 + $0x38] sm:$0xff] }
 0x541   : > { %v1060_v62 = vpop.permute.xlu1 %1059 }
 0x542   : > { %v1062_v63 = vsel %vm730_vm2, %v889_v58, %v1060_v62  ;;  %v2244_v58 = vld [vmem:[%s3060_s5 + $0x28] sm:$0xff]  ;;  %v2535_v62 = vpack.c.bf16 %v2246_v61, %v2245_v60 }
 0x543   : > { %2397 = vmatmul.mubr.msk.f32.vlgmr.msra.gmra.mrb[2].mxu0 %vm653_vm1, %v1062_v63  ;;  %v2532_v59 = vpack.c.bf16 %v2244_v58, %v2243_v57 }
 0x544   : > { %2426 = vmatprep.mubr.msk.f32.mxu0 %vm2614_vm0, %v2615_v10  ;;  %2521 = vmatpush3.bf16.msra.mxu0 %v2520_v22 }
 0x545   : > { %2522 = vmatprep.subr.bf16.mxu0 %v2613_v4 }
 0x548   : > { %2524 = vmatpush3.bf16.msra.mxu0 %v2523_v24 }
 0x549   : > { %2525 = vmatprep.subr.bf16.mxu0 %v2613_v4 }
 0x54c   : > { %2527 = vmatpush3.bf16.msra.mxu0 %v2526_v28 }
 0x54d   : > { %2528 = vmatprep.subr.bf16.mxu0 %v2613_v4 }
 0x550   : > { %2530 = vmatpush3.bf16.msra.mxu0 %v2529_v40 }
 0x551   : > { %2450 = vmatprep.subr.mxu0 %v2615_v10 }
 0x616   : > { %v1143_v1 = vpop.f32.mrb[2].mxu0 }
 0x617   : > { %v1144_v2 = vadd.f32 %v2233_v0, %v1143_v1  ;;  %v2398_v3 = vpop.f32.mrb[3].mxu0 }
 0x618   : > { %v2241_v3 = vld [vmem:[%s3070_s15] ss:$0 sm:$0xff] }
 0x619   : > { %v1147_v5 = vadd.f32 %v1144_v2, %v2768_v17  ;;  %v1181_v17 = vld [vmem:[%s3066_s11 + $0x18] sm:$0xff] }
 0x61a   : > { %v2517_v18 = vpack.c.bf16 %v1181_v17, %v1180_v16 }
 0x61b   : > { %v1150_v6 = vsel %vm653_vm1, %v1147_v5, 0.0 }
 0x61c   : > { %1151 = vadd.xlane.f32.xlu1 %v1150_v6  ;;  %2518 = vmatpush3.bf16.msra.mxu1 %v2517_v18  ;;  %v2242_v6 = vld [vmem:[%s3071_s16] ss:$0 sm:$0xff] }
 0x61d   : > { %2531 = vmatprep.subr.bf16.mxu1 %v2613_v4 }
 0x6a9   : > { %v1152_v7 = vpop.xlane.xlu1 %1151 }
 0x6aa   : > { %v1154_v8 = vmul.f32 0.03125, %v1152_v7 }
 0x6ac   : > { %v1155_v9 = vsub.f32 %v1147_v5, %v1154_v8 }
 0x6ae   : > { %v1156_v11 = vmul.f32 %v1155_v9, %v1155_v9 }
 0x6b0   : > { %v1157_v12 = vsel %vm653_vm1, %v1156_v11, 0.0 }
 0x6b1   : > { %1158 = vadd.xlane.f32.xlu0 %v1157_v12 }
 0x73e   : > { %v1159_v29 = vpop.xlane.xlu0 %1158 }
 0x73f   : > { %v1160_v30 = vmul.f32 0.03125, %v1159_v29 }
 0x741   : > { %v1161_v31 = vadd.f32 1e-05, %v1160_v30 }
 0x743   : > { %2588 = vrsqrt.f32 %v1161_v31 }
 0x74d   : > { %v2589_v32 = vpop.eup %2588 }
 0x74e   : > { %v1163_v34 = vmul.f32 %v2589_v32, %v1155_v9  ;;  %v2248_v9 = vld [vmem:[%s3061_s6 + $0x1] ss:$0 sm:$0xff] }
 0x750   : > { %v1170_v36 = vmul.f32 %v2235_v33, %v1163_v34 }
 0x752   : > { %v1177_v37 = vadd.f32 %v2236_v35, %v1170_v36 }
 0x754   : > { %2408 = vmatmul.mubr.msk.f32.vlgmr.msra.gmra.mrb[8].mxu1 %vm653_vm1, %v1177_v37 }
 0x755   : > { %2437 = vmatprep.mubr.msk.f32.mxu1 %vm2614_vm0, %v2615_v10  ;;  %2533 = vmatpush3.bf16.msra.mxu1 %v2532_v59 }
 0x756   : > { %2534 = vmatprep.subr.bf16.mxu1 %v2613_v4 }
 0x759   : > { %2536 = vmatpush3.bf16.msra.mxu1 %v2535_v62 }
 0x75a   : > { %2440 = vmatprep.subr.mxu1 %v2615_v10 }
 0x827   : > { %v1258_v42 = vpop.f32.mrb[8].mxu1 }
 0x828   : > { %v1259_v43 = vadd.f32 %v2237_v41, %v1258_v42  ;;  %v2409_v44 = vpop.f32.mrb[9].mxu1 }
 0x829   : > { %v2257_v44 = vld [vmem:[%s3062_s7 + $0x28] sm:$0xff] }
 0x82a   : > { %v1262_v45 = vmax.f32 %v1259_v43, 0.0  ;;  %v2256_v43 = vld [vmem:[%s3062_s7 + $0x20] sm:$0xff] }
 0x82c   : > { %2427 = vmatmul.mubr.msk.f32.vlgmr.msra.gmra.mrb[4].mxu0 %vm1278_vm4, %v1262_v45  ;;  %v2258_v45 = vld [vmem:[%s3062_s7 + $0x30] sm:$0xff] }
 0x82d   : > { %2452 = vmatprep.mubr.msk.f32.mxu0 %vm2614_vm0, %v2615_v10 }
 0x8ff   : > { %v1348_v47 = vpop.f32.mrb[4].mxu0 }
 0x900   : > { %v1349_v48 = vadd.f32 %v2239_v46, %v1348_v47  ;;  %v2428_v49 = vpop.f32.mrb[5].mxu0  ;;  %v2538_v46 = vpack.c.bf16 %v2257_v44, %v2256_v43  ;;  %v2259_v47 = vld [vmem:[%s3062_s7 + $0x38] sm:$0xff] }
 0x902   : > { %v1352_v50 = vadd.f32 %v1349_v48, %v1177_v37  ;;  %v2541_v48 = vpack.c.bf16 %v2259_v47, %v2258_v45 }
 0x904   : > { %v1355_v51 = vsel %vm653_vm1, %v1352_v50, 0.0 }
 0x905   : > { %1356 = vadd.xlane.f32.xlu0 %v1355_v51 }
 0x992   : > { %v1357_v52 = vpop.xlane.xlu0 %1356 }
 0x993   : > { %v1358_v53 = vmul.f32 0.03125, %v1357_v52 }
 0x995   : > { %v1359_v54 = vsub.f32 %v1352_v50, %v1358_v53 }
 0x997   : > { %v1360_v55 = vmul.f32 %v1359_v54, %v1359_v54 }
 0x999   : > { %v1361_v56 = vsel %vm653_vm1, %v1360_v55, 0.0  ;;  %v2261_v55 = vld [vmem:[%s3063_s8 + $0x1] ss:$0 sm:$0xff] }
 0x99a   : > { %1362 = vadd.xlane.f32.xlu1 %v1361_v56 }
 0xa27   : > { %v1363_v63 = vpop.xlane.xlu1 %1362 }
 0xa28   : > { %v1364_v0 = vmul.f32 0.03125, %v1363_v63 }
 0xa2a   : > { %v1365_v1 = vadd.f32 1e-05, %v1364_v0 }
 0xa2c   : > { %2590 = vrsqrt.f32 %v1365_v1 }
 0xa36   : > { %v2591_v2 = vpop.eup %2590 }
 0xa37   : > { %v1367_v5 = vmul.f32 %v2591_v2, %v1359_v54  ;;  %v2268_v2 = vld [vmem:[%s3066_s11 + $0x28] sm:$0xff] }
 0xa39   : > { %v1374_v7 = vmul.f32 %v2241_v3, %v1367_v5  ;;  %v2269_v5 = vld [vmem:[%s3066_s11 + $0x30] sm:$0xff] }
 0xa3b   : > { %v2919_v8 = vadd.f32 %v2242_v6, %v1374_v7  ;;  %v2270_v6 = vld [vmem:[%s3066_s11 + $0x38] sm:$0xff] }
 0xa3c   : > { %v2547_v7 = vpack.c.bf16 %v2270_v6, %v2269_v5 }
 0xa3d   : > { %2438 = vmatmul.mubr.msk.f32.vlgmr.msra.gmra.mrb[10].mxu1 %vm653_vm1, %v2919_v8 }
 0xa3e   : > { %2442 = vmatprep.mubr.msk.f32.mxu1 %vm2614_vm0, %v2615_v10 }
 0xb10   : > { %v1464_v11 = vpop.f32.mrb[10].mxu1 }
 0xb11   : > { %v1465_v12 = vadd.f32 %v2248_v9, %v1464_v11  ;;  %v2439_v13 = vpop.f32.mrb[11].mxu1  ;;  %v2275_v9 = vld [vmem:[%s3068_s13 + $0x48] sm:$0xff]  ;;  %v2276_v11 = vld [vmem:[%s3068_s13 + $0x50] sm:$0xff] }
 0xb12   : > { %v2277_v13 = vld [vmem:[%s3068_s13 + $0x58] sm:$0xff] }
 0xb13   : > { %1634 = vrot.lane.b32.xlu1 %v1465_v12, %s2616_s27  ;;  %1469 = vrot.lane.b32.xlu0 %v1465_v12, %s2617_s28 }
 0xb17   : > { %1632 = vrot.lane.b32.xlu1 %v1465_v12, %s2618_s29 }
 0xb85   : > { %v1635_v14 = vpop.permute.xlu1 %1634  ;;  %v1470_v15 = vpop.permute.xlu0 %1469 }
 0xb86   : > { %2441 = vmatpush3.xpose.msk.msra.mxu1 %vm730_vm2, %v1470_v15  ;;  %2451 = vmatpush3.xpose.msk.msra.mxu0 %vm730_vm2, %v1635_v14  ;;  %v2553_v14 = vpack.c.bf16 %v2277_v13, %v2276_v11  ;;  %v2278_v15 = vld [vmem:[%s3068_s13 + $0x60] sm:$0xff] }
 0xb87   : > { %2445 = vmatprep.subr.mxu1 %v2615_v10  ;;  %2537 = vmatprep.subr.bf16.mxu0 %v2613_v4 }
 0xb89   : > { %v1633_v16 = vpop.permute.xlu1 %1632  ;;  %2443 = vmatmul.mubr.msk.f32.vlgmr.msra.gmra.mrb[12].mxu1 %vm730_vm2, %v1465_v12 }
 0xb8a   : > { %2453 = vmatmul.mubr.msk.f32.vlgmr.msra.gmra.mrb[6].mxu0 %vm730_vm2, %v1633_v16  ;;  %2447 = vmatprep.mubr.msk.f32.mxu1 %vm2614_vm0, %v2615_v10  ;;  %v2279_v16 = vld [vmem:[%s3068_s13 + $0x68] sm:$0xff] }
 0xb8b   : > { %2468 = vmatprep.mubr.msk.f32.mxu0 %vm2614_vm0, %v2615_v10  ;;  %2539 = vmatpush3.bf16.msra.mxu0 %v2538_v46 }
 0xb8c   : > { %2540 = vmatprep.subr.bf16.mxu0 %v2613_v4 }
 0xb8f   : > { %2542 = vmatpush3.bf16.msra.mxu0 %v2541_v48 }
 0xb90   : > { %2549 = vmatprep.subr.bf16.mxu0 %v2613_v4 }
 0xc5c   : > { %v1541_v17 = vpop.f32.mrb[12].mxu1 }
 0xc5d   : > { %v1542_v18 = vadd.f32 %v1541_v17, %v2794_v25  ;;  %v2444_v19 = vpop.f32.mrb[13].mxu1  ;;  %v1706_v20 = vpop.f32.mrb[6].mxu0  ;;  %v2556_v17 = vpack.c.bf16 %v2279_v16, %v2278_v15 }
 0xc5e   : > { %v1707_v21 = vadd.f32 %v1706_v20, %v2794_v25  ;;  %v2454_v22 = vpop.f32.mrb[7].mxu0 }
 0xc5f   : > { %v1545_v23 = vsel %vm805_vm3, %v1542_v18, -inf  ;;  %v2265_v22 = vld [vmem:[%s3064_s9 + $0x1] ss:$0 sm:$0xff] }
 0xc60   : > { %1546 = vmax.xlane.f32.xlu0 %v1545_v23  ;;  %v1710_v24 = vsel %vm805_vm3, %v1707_v21, -inf }
 0xc61   : > { %1711 = vmax.xlane.f32.xlu1 %v1710_v24  ;;  %v2266_v24 = vld [vmem:[%s3065_s10 + $0x1] ss:$0 sm:$0xff] }
 0xc72   : > { %1556 = vrot.lane.b32.xlu1 %v1465_v12, %s2619_s22 }
 0xced   : > { %v1547_v26 = vpop.xlane.xlu0 %1546 }
 0xcee   : > { %v1548_v27 = vsub.f32 %v1542_v18, %v1547_v26  ;;  %v1712_v28 = vpop.xlane.xlu1 %1711 }
 0xcef   : > { %v1713_v29 = vsub.f32 %v1707_v21, %v1712_v28  ;;  %v2281_v28 = vld [vmem:[%s3068_s13 + $0x78] sm:$0xff] }
 0xcf0   : > { %v1549_v30 = vmul.f32 1.442695, %v1548_v27 }
 0xcf1   : > { %v1714_v31 = vmul.f32 1.442695, %v1713_v29 }
 0xcf2   : > { %2592 = vpow2.f32 %v1549_v30  ;;  %v1557_v32 = vpop.permute.xlu1 %1556  ;;  %v2272_v30 = vld [vmem:[%s3067_s12 + $0x1] ss:$0 sm:$0xff] }
 0xcf3   : > { %2446 = vmatpush3.msra.mxu1 %v1557_v32  ;;  %2594 = vpow2.f32 %v1714_v31 }
 0xcf4   : > { %2455 = vmatprep.subr.mxu1 %v2615_v10 }
 0xcfc   : > { %v2593_v25 = vpop.eup %2592 }
 0xcfd   : > { %v1551_v33 = vsel %vm805_vm3, %v2593_v25, 0.0  ;;  %v2595_v34 = vpop.eup %2594 }
 0xcfe   : > { %1552 = vadd.xlane.f32.xlu0 %v1551_v33  ;;  %v1716_v35 = vsel %vm805_vm3, %v2595_v34, 0.0 }
 0xd02   : > { %1717 = vadd.xlane.f32.xlu0 %v1716_v35 }
 0xd18   : > { %1721 = vrot.lane.b32.xlu0 %v1465_v12, %s2620_s18 }
 0xd8b   : > { %v1553_v36 = vpop.xlane.xlu0 %1552 }
 0xd8c   : > { %2596 = vrcp.f32 %v1553_v36 }
 0xd8f   : > { %v1718_v37 = vpop.xlane.xlu0 %1717 }
 0xd90   : > { %2598 = vrcp.f32 %v1718_v37 }
 0xd93   : > { %v1722_v40 = vpop.permute.xlu0 %1721 }
 0xd96   : > { %v2597_v38 = vpop.eup %2596 }
 0xd97   : > { %v1555_v39 = vmul.f32 %v2597_v38, %v2593_v25 }
 0xd99   : > { %2448 = vmatmul.mubr.msk.f32.vlgmr.msra.gmra.mrb[14].mxu1 %vm805_vm3, %v1555_v39 }
 0xd9a   : > { %v2599_v41 = vpop.eup %2598  ;;  %2456 = vmatpush3.msra.mxu1 %v1722_v40  ;;  %2457 = vmatprep.mubr.msk.f32.mxu1 %vm2614_vm0, %v2615_v10 }
 0xd9b   : > { %v1720_v42 = vmul.f32 %v2599_v41, %v2595_v34  ;;  %2543 = vmatprep.subr.bf16.mxu1 %v2613_v4  ;;  %v2283_v34 = vld [vmem:[%s3069_s14 + $0x1] ss:$0 sm:$0xff] }
 0xd9d   : > { %2458 = vmatmul.mubr.msk.f32.vlgmr.msra.gmra.mrb[16].mxu1 %vm805_vm3, %v1720_v42 }
 0xd9e   : > { %2479 = vmatprep.mubr.msk.f32.mxu1 %vm2614_vm0, %v2615_v10 }
 0xe6c   : > { %v1628_v49 = vpop.f32.mrb[14].mxu1 }
 0xe6d   : > { %v2449_v50 = vpop.f32.mrb[15].mxu1 }
 0xe70   : > { %v1793_v51 = vpop.f32.mrb[16].mxu1 }
 0xe71   : > { %1798 = vrot.lane.b32.xlu1 %v1793_v51, %s3084_s1  ;;  %v2459_v52 = vpop.f32.mrb[17].mxu1  ;;  %v2288_v51 = vld [vmem:[%s3071_s16 + $0x1] ss:$0 sm:$0xff] }
 0xee3   : > { %v1799_v53 = vpop.permute.xlu1 %1798 }
 0xee4   : > { %v1801_v54 = vsel %vm730_vm2, %v1628_v49, %v1799_v53  ;;  %v2287_v49 = vld [vmem:[%s3070_s15 + $0x1] ss:$0 sm:$0xff]  ;;  %v2289_v53 = vld [vmem:[%s3072_s17] ss:$0 sm:$0xff] }
 0xee5   : > { %2469 = vmatmul.mubr.msk.f32.vlgmr.msra.gmra.mrb[8].mxu0 %vm653_vm1, %v1801_v54 }
 0xee6   : > { %2498 = vmatprep.mubr.msk.f32.mxu0 %vm2614_vm0, %v2615_v10  ;;  %v2267_v10 = vld [vmem:[%s3066_s11 + $0x20] sm:$0xff] }
 0xee7   : > { %v2544_v3 = vpack.c.bf16 %v2268_v2, %v2267_v10 }
 0xee9   : > { %2545 = vmatpush3.bf16.msra.mxu1 %v2544_v3 }
 0xeea   : > { %2546 = vmatprep.subr.bf16.mxu1 %v2613_v4 }
 0xeed   : > { %2548 = vmatpush3.bf16.msra.mxu1 %v2547_v7 }
 0xfb8   : > { %v1884_v56 = vpop.f32.mrb[8].mxu0 }
 0xfb9   : > { %v1885_v57 = vadd.f32 %v2261_v55, %v1884_v56  ;;  %v2470_v58 = vpop.f32.mrb[9].mxu0 }
 0xfbb   : > { %v1888_v59 = vadd.f32 %v1885_v57, %v2919_v8  ;;  %v2274_v8 = vld [vmem:[%s3068_s13 + $0x40] sm:$0xff] }
 0xfbc   : > { %v2550_v12 = vpack.c.bf16 %v2275_v9, %v2274_v8  ;;  %v2290_v57 = vld [vmem:[#allocation2] ss:$0 sm:$0xff] }
 0xfbd   : > { %v1893_v60 = vsel %vm653_vm1, %v1888_v59, 0.0 }
 0xfbe   : > { %1894 = vadd.xlane.f32.xlu1 %v1893_v60  ;;  %2551 = vmatpush3.bf16.msra.mxu0 %v2550_v12 }
 0xfbf   : > { %2552 = vmatprep.subr.bf16.mxu0 %v2613_v4 }
 0xfc2   : > { %2554 = vmatpush3.bf16.msra.mxu0 %v2553_v14 }
 0xfc3   : > { %2555 = vmatprep.subr.bf16.mxu0 %v2613_v4 }
 0xfc6   : > { %2557 = vmatpush3.bf16.msra.mxu0 %v2556_v17 }
 0xfc7   : > { %2558 = vmatprep.subr.bf16.mxu0 %v2613_v4  ;;  %v2280_v4 = vld [vmem:[%s3068_s13 + $0x70] sm:$0xff] }
 0xfc8   : > { %v2559_v29 = vpack.c.bf16 %v2281_v28, %v2280_v4 }
 0xfca   : > { %2560 = vmatpush3.bf16.msra.mxu0 %v2559_v29 }
0x104b   : > { %v1895_v61 = vpop.xlane.xlu1 %1894 }
0x104c   : > { %v1896_v62 = vmul.f32 0.03125, %v1895_v61 }
0x104e   : > { %v1897_v63 = vsub.f32 %v1888_v59, %v1896_v62 }
0x1050   : > { %v1898_v0 = vmul.f32 %v1897_v63, %v1897_v63 }
0x1052   : > { %v1899_v1 = vsel %vm653_vm1, %v1898_v0, 0.0 }
0x1053   : > { %1900 = vadd.xlane.f32.xlu0 %v1899_v1 }
0x10e0   : > { %v1901_v18 = vpop.xlane.xlu0 %1900 }
0x10e1   : > { %v1902_v19 = vmul.f32 0.03125, %v1901_v18 }
0x10e3   : > { %v1903_v20 = vadd.f32 1e-05, %v1902_v19 }
0x10e5   : > { %2600 = vrsqrt.f32 %v1903_v20 }
0x10ef   : > { %v2601_v21 = vpop.eup %2600 }
0x10f0   : > { %v1905_v23 = vmul.f32 %v2601_v21, %v1897_v63 }
0x10f2   : > { %v1912_v26 = vmul.f32 %v2265_v22, %v1905_v23 }
0x10f4   : > { %v1919_v27 = vadd.f32 %v2266_v24, %v1912_v26 }
0x10f6   : > { %2480 = vmatmul.mubr.msk.f32.vlgmr.msra.gmra.mrb[18].mxu1 %vm653_vm1, %v1919_v27 }
0x11c9   : > { %v2002_v31 = vpop.f32.mrb[18].mxu1 }
0x11ca   : > { %v2003_v32 = vadd.f32 %v2272_v30, %v2002_v31  ;;  %v2481_v25 = vpop.f32.mrb[19].mxu1 }
0x11cc   : > { %v2006_v33 = vmax.f32 %v2003_v32, 0.0 }
0x11ce   : > { %2499 = vmatmul.mubr.msk.f32.vlgmr.msra.gmra.mrb[10].mxu0 %vm1278_vm4, %v2006_v33 }
0x12a1   : > { %v2093_v35 = vpop.f32.mrb[10].mxu0 }
0x12a2   : > { %v2094_v36 = vadd.f32 %v2283_v34, %v2093_v35  ;;  %v2500_v37 = vpop.f32.mrb[11].mxu0 }
0x12a4   : > { %v2097_v38 = vadd.f32 %v2094_v36, %v1919_v27 }
0x12a6   : > { %v2102_v39 = vsel %vm653_vm1, %v2097_v38, 0.0 }
0x12a7   : > { %2103 = vadd.xlane.f32.xlu0 %v2102_v39 }
0x1334   : > { %v2104_v40 = vpop.xlane.xlu0 %2103 }
0x1335   : > { %v2105_v41 = vmul.f32 0.03125, %v2104_v40 }
0x1337   : > { %v2106_v42 = vsub.f32 %v2097_v38, %v2105_v41 }
0x1339   : > { %v2107_v43 = vmul.f32 %v2106_v42, %v2106_v42 }
0x133b   : > { %v2108_v44 = vsel %vm653_vm1, %v2107_v43, 0.0 }
0x133c   : > { %2109 = vadd.xlane.f32.xlu1 %v2108_v44 }
0x13c9   : > { %v2110_v45 = vpop.xlane.xlu1 %2109 }
0x13ca   : > { %v2111_v46 = vmul.f32 0.03125, %v2110_v45 }
0x13cc   : > { %v2112_v47 = vadd.f32 1e-05, %v2111_v46 }
0x13ce   : > { %2602 = vrsqrt.f32 %v2112_v47 }
0x13d8   : > { %v2603_v48 = vpop.eup %2602 }
0x13d9   : > { %v2114_v50 = vmul.f32 %v2603_v48, %v2106_v42 }
0x13db   : > { %v2121_v52 = vmul.f32 %v2287_v49, %v2114_v50 }
0x13dd   : > { %v2128_v54 = vadd.f32 %v2288_v51, %v2121_v52 }
0x13df   : > { %v2136_v55 = vmul.f32 %v2289_v53, %v2128_v54 }
0x13e1   : > { %v2137_v56 = vsel %vm653_vm1, %v2136_v55, 0.0 }
0x13e2   : > { %2138 = vadd.xlane.f32.xlu0 %v2137_v56 }
0x146f   : > { %v2139_v58 = vpop.xlane.xlu0 %2138 }
0x1470   : > { %v2147_v59 = vadd.f32 %v2290_v57, %v2139_v58 }
0x1472   : > { %2149 = vst.msk [vmem:[%s616_s21] sm:$0xff] %vm2148_vm5, %v2147_v59 }
0x1473 PF: > { %s31_s20 = sadd.s32 1, %s2610_s20  }
0x1474   : > { %p28_p4 = scmp.ge.s32.totalorder %s31_s20, 4  }
0x1476   :  { %30 = sbr.rel (!%p28_p4) target bundleno = 5 (0x5), region = 141 }

</bundles_post_ra>
